<compile_context>
chip_gen: v7x
topology: tpu7x:2x2x1
jax: 0.10.0
libtpu: 0.0.40
codegen_flags: <defaults>
</compile_context>

<pallas_src>
import functools

import jax
import jax.numpy as jnp
from jax.experimental import pallas as pl
from jax.experimental.pallas import tpu as pltpu


# ----------------------------------------------------------------------------
# Kernel 1: patch-embedding matmul, tiled over rows:  (tm, D) @ (D, C) + b
# ----------------------------------------------------------------------------
def _patch_embed_kernel(x_ref, w_ref, b_ref, o_ref):
    acc = jnp.dot(x_ref[...], w_ref[...], preferred_element_type=jnp.float32)
    o_ref[...] = (acc + b_ref[...]).astype(o_ref.dtype)


def patch_embed(x, w, b, tm=128):
    """x: (P, D) bf16, w: (D, C) bf16, b: (C,) f32 -> (P, C) bf16."""
    P, D = x.shape
    C = w.shape[1]
    gm = (P + tm - 1) // tm
    Pp = gm * tm
    if Pp != P:
        # pad rows to a tile multiple (keeps pipelining / parallel grid intact)
        x = jnp.pad(x, ((0, Pp - P), (0, 0)))
    out = pl.pallas_call(
        _patch_embed_kernel,
        out_shape=jax.ShapeDtypeStruct((Pp, C), jnp.bfloat16),
        grid=(gm,),
        in_specs=[
            pl.BlockSpec((tm, D), lambda i: (i, 0)),
            pl.BlockSpec((D, C), lambda i: (0, 0)),
            pl.BlockSpec((1, C), lambda i: (0, 0)),
        ],
        out_specs=pl.BlockSpec((tm, C), lambda i: (i, 0)),
        compiler_params=pltpu.CompilerParams(
            dimension_semantics=("parallel",)),
    )(x, w, b.reshape(1, C))
    return out[:P]


# ----------------------------------------------------------------------------
# Kernel 2: fused mask-decoder + bilinear upsample (per batch element)
#   src   = img_emb + no_mask                         (HW, C)
#   attn  = softmax(tokens @ (src + pe)^T / sqrt(C))
#   tok  += attn @ src
#   hyper = MLP(tok[0])                               (1, C)
#   g     = hyper . src  (per pixel, flat HW)         (1, HW)
#   out   = g @ U        (bilinear, align_corners=F)  (1, H*W)  lane-dense
# ----------------------------------------------------------------------------
def _decoder_kernel(img_ref, pe_ref, nomask_ref, tok_ref,
                    w1_ref, b1_ref, w2_ref, b2_ref, up_ref, o_ref):
    src = img_ref[0] + nomask_ref[...]              # (HW, C) bf16
    k = src + pe_ref[...]                           # (HW, C) bf16
    tok = tok_ref[0]                                # (Nt, C) bf16
    C = src.shape[-1]
    scale = 1.0 / (C ** 0.5)

    # cross attention: tokens attend to image pixels (bf16 MXU, f32 acc)
    # TODO(synk): at real scale check with pl.lower_as_mlir that this
    # contraction does not emit an XLU transpose of the (HW, C) k tile; if it
    # does, feed k pre-transposed as (C, HW).
    logits = jax.lax.dot_general(
        tok, k, (((1,), (1,)), ((), ())),
        preferred_element_type=jnp.float32) * scale          # (Nt, HW) f32
    m = jnp.max(logits, axis=-1, keepdims=True)
    p = jnp.exp(logits - m)
    attn = p * pl.reciprocal(jnp.sum(p, axis=-1, keepdims=True), approx=True)
    tok_upd = tok.astype(jnp.float32) + jnp.dot(
        attn.astype(jnp.bfloat16), src, preferred_element_type=jnp.float32)

    # hypernetwork MLP on the mask token (row 0)
    mask_tok = tok_upd[0:1].astype(jnp.bfloat16)              # (1, C)
    h = jnp.maximum(
        jnp.dot(mask_tok, w1_ref[...], preferred_element_type=jnp.float32)
        + b1_ref[...], 0.0)
    hyper = (jnp.dot(h.astype(jnp.bfloat16), w2_ref[...],
                     preferred_element_type=jnp.float32)
             + b2_ref[...])                                   # (1, C) f32

    # per-pixel mask logits on the flat HW axis
    g_row = jax.lax.dot_general(
        hyper.astype(jnp.bfloat16), src, (((1,), (1,)), ((), ())),
        preferred_element_type=jnp.float32)                   # (1, HW) f32

    # fused bilinear upsample (align_corners=False) as ONE lane-dense bf16
    # MXU matmul; output store is a full multiple of 128 lanes (unmasked vst).
    o_ref[0] = jnp.dot(g_row.astype(jnp.bfloat16), up_ref[...],
                       preferred_element_type=jnp.float32)    # (1, H*W) f32


def mask_decoder_upsample(img_emb, dense_pe, nomask, tokens,
                          w1, b1, w2, b2, up):
    B, HW, C = img_emb.shape
    Nt = tokens.shape[1]
    HWout = up.shape[1]
    # TODO(synk): at real scale single-buffer the batch-invariant operands
    # (dense_pe, nomask, w1/b1, w2/b2, up) via pipeline_mode=pl.Buffered(1)
    # to save VMEM on v7x (64 MiB).
    return pl.pallas_call(
        _decoder_kernel,
        out_shape=jax.ShapeDtypeStruct((B, 1, HWout), jnp.float32),
        grid=(B,),
        in_specs=[
            pl.BlockSpec((1, HW, C), lambda b: (b, 0, 0)),
            pl.BlockSpec((HW, C), lambda b: (0, 0)),
            pl.BlockSpec((1, C), lambda b: (0, 0)),
            pl.BlockSpec((1, Nt, C), lambda b: (b, 0, 0)),
            pl.BlockSpec((C, C), lambda b: (0, 0)),
            pl.BlockSpec((1, C), lambda b: (0, 0)),
            pl.BlockSpec((C, C), lambda b: (0, 0)),
            pl.BlockSpec((1, C), lambda b: (0, 0)),
            pl.BlockSpec((HW, HWout), lambda b: (0, 0)),
        ],
        out_specs=pl.BlockSpec((1, 1, HWout), lambda b: (b, 0, 0)),
        compiler_params=pltpu.CompilerParams(
            dimension_semantics=("parallel",)),
    )(img_emb, dense_pe, nomask, tokens,
      w1, b1.reshape(1, C), w2, b2.reshape(1, C), up)


# ----------------------------------------------------------------------------
# Plain-JAX glue (parameter setup, positional encodings, interpolation setup)
# ----------------------------------------------------------------------------
def interp_matrix(out_size, in_size):
    """PyTorch F.interpolate(mode='bilinear', align_corners=False) weights."""
    scale = in_size / out_size
    dst = jnp.arange(out_size, dtype=jnp.float32)
    src = scale * (dst + 0.5) - 0.5
    src = jnp.maximum(src, 0.0)
    x0 = jnp.minimum(jnp.floor(src).astype(jnp.int32), in_size - 1)
    x1 = jnp.minimum(x0 + 1, in_size - 1)
    lam = src - x0.astype(jnp.float32)
    w = jnp.zeros((out_size, in_size), jnp.float32)
    rows = jnp.arange(out_size)
    w = w.at[rows, x0].add(1.0 - lam)
    w = w.at[rows, x1].add(lam)
    return w


def pos_encode(coords, gauss):
    """SAM-style random-Fourier positional encoding; coords in [0,1]."""
    c = 2.0 * coords - 1.0
    c = c @ gauss
    c = 2.0 * jnp.pi * c
    return jnp.concatenate([jnp.sin(c), jnp.cos(c)], axis=-1)


def init_params(key, c_in=3, patch=8, embed=128):
    ks = jax.random.split(key, 10)
    d = c_in * patch * patch
    scale = 0.02
    return {
        "patch_w": scale * jax.random.normal(ks[0], (d, embed), jnp.float32),
        "patch_b": scale * jax.random.normal(ks[1], (embed,), jnp.float32),
        "pe_gauss": jax.random.normal(ks[2], (2, embed // 2), jnp.float32),
        "pt_emb1": scale * jax.random.normal(ks[3], (embed,), jnp.float32),
        "pt_emb2": scale * jax.random.normal(ks[4], (embed,), jnp.float32),
        "no_mask": scale * jax.random.normal(ks[5], (embed,), jnp.float32),
        "mask_tok": scale * jax.random.normal(ks[6], (embed,), jnp.float32),
        "hyper_w1": scale * jax.random.normal(ks[7], (embed, embed), jnp.float32),
        "hyper_b1": jnp.zeros((embed,), jnp.float32),
        "hyper_w2": scale * jax.random.normal(ks[8], (embed, embed), jnp.float32),
        "hyper_b2": jnp.zeros((embed,), jnp.float32),
    }


def build_consts(params, H, W, patch=8):
    """Shape-only host constants, built ONCE (hoisted out of the forward)."""
    He, We = H // patch, W // patch
    HW = He * We
    # dense positional encoding for the image grid (prompt_encoder.get_dense_pe)
    ys = (jnp.arange(He, dtype=jnp.float32) + 0.5) / He
    xs = (jnp.arange(We, dtype=jnp.float32) + 0.5) / We
    gy, gx = jnp.meshgrid(ys, xs, indexing="ij")
    grid_pts = jnp.stack([gx, gy], -1).reshape(HW, 2)
    dense_pe = pos_encode(grid_pts, params["pe_gauss"]).astype(jnp.bfloat16)
    # bilinear (align_corners=False) upsample folded into a single (HW, H*W)
    # bf16 matrix:  U[i*We+j, y*W+x] = Wy[y,i] * Wx[x,j]
    wy = interp_matrix(H, He)            # (H, He)
    wx = interp_matrix(W, We)            # (W, We)
    up = jnp.einsum("yi,xj->ijyx", wy, wx).reshape(HW, H * W)
    return {"dense_pe": dense_pe, "up": up.astype(jnp.bfloat16)}


@functools.partial(jax.jit, static_argnames=("patch",))
def sam_forward(image, box, params, consts, patch=8):
    # image: (B, C_in, H, W) NCHW;  box: (B, 4) = (x0, y0, x1, y1)
    B, Cin, H, W = image.shape
    He, We = H // patch, W // patch
    HW = He * We
    C = params["patch_w"].shape[1]

    # ---- image encoder: patchify + tiled Pallas matmul (bf16 in, f32 acc) ----
    # TODO(synk): at real image sizes fuse patch extraction into the kernel
    # (grid over (B, He-tiles)) to avoid the extra HBM round-trip.
    x = image.reshape(B, Cin, He, patch, We, patch)
    x = jnp.transpose(x, (0, 2, 4, 1, 3, 5)).reshape(B * HW, Cin * patch * patch)
    img_emb = patch_embed(x.astype(jnp.bfloat16),
                          params["patch_w"].astype(jnp.bfloat16),
                          params["patch_b"])
    img_emb = img_emb.reshape(B, HW, C)

    # ---- prompt encoder (frozen / no_grad in torch) ----
    corners = box.astype(jnp.float32).reshape(B, 2, 2) + 0.5
    corners = corners / jnp.array([W, H], jnp.float32)
    sparse = pos_encode(corners, params["pe_gauss"])               # (B, 2, C)
    sparse = sparse + jnp.stack([params["pt_emb1"], params["pt_emb2"]])[None]

    # tokens: [mask_token, 2 box corners], zero-padded to 8 (full sublane tile)
    Nt = 8
    tokens = jnp.concatenate(
        [jnp.broadcast_to(params["mask_tok"][None, None, :], (B, 1, C)), sparse],
        axis=1)                                                    # (B, 3, C)
    tokens = jnp.pad(tokens, ((0, 0), (0, Nt - tokens.shape[1]), (0, 0)))

    # ---- fused mask decoder + bilinear upsample (single Pallas call) ----
    out = mask_decoder_upsample(
        img_emb,
        consts["dense_pe"],
        params["no_mask"].reshape(1, C).astype(jnp.bfloat16),
        tokens.astype(jnp.bfloat16),
        params["hyper_w1"].astype(jnp.bfloat16), params["hyper_b1"],
        params["hyper_w2"].astype(jnp.bfloat16), params["hyper_b2"],
        consts["up"])                                              # (B, 1, H*W)
    return out.reshape(B, 1, H, W)


if __name__ == "__main__":
    key = jax.random.PRNGKey(0)
    k_img, k_par = jax.random.split(key, 2)

    B, Cin, H, W = 2, 3, 64, 64
    image = jax.random.normal(k_img, (B, Cin, H, W), jnp.float32)
    # boxes (x0, y0, x1, y1) in pixel coordinates
    box = jnp.array([[8.0, 8.0, 40.0, 48.0],
                     [16.0, 4.0, 56.0, 60.0]], jnp.float32)
    params = init_params(k_par, c_in=Cin, patch=8, embed=128)
    consts = build_consts(params, H, W, patch=8)   # hoisted host-side constants

    out = sam_forward(image, box, params, consts)
    jax.block_until_ready(out)
    assert out.shape == (B, 1, H, W), out.shape
    assert bool(jnp.all(jnp.isfinite(out)))
    print("KERNEL_OK")
</pallas_src>

<mosaic_0001>
module attributes {stable_mosaic.version = 11 : i64} {
  func.func @_patch_embed_kernel(%arg0: i32, %arg1: memref<128x192xbf16, #tpu.memory_space<vmem>>, %arg2: memref<192x128xbf16, #tpu.memory_space<vmem>>, %arg3: memref<1x128xf32, #tpu.memory_space<vmem>>, %arg4: memref<128x128xbf16, #tpu.memory_space<vmem>>) attributes {dimension_semantics = [#tpu.dimension_semantics<parallel>], iteration_bounds = array<i64: 1>, scalar_prefetch = 0 : i64, scratch_operands = 0 : i64, tpu.core_type = #tpu.core_type<tc>, window_params = [{transform_indices = @transform_0, window_bounds = array<i64: 128, 192>}, {pipeline_mode = #tpu.pipeline_mode<synchronous>, transform_indices = @transform_1, window_bounds = array<i64: 192, 128>}, {pipeline_mode = #tpu.pipeline_mode<synchronous>, transform_indices = @transform_2, window_bounds = array<i64: 1, 128>}, {transform_indices = @transform_3, window_bounds = array<i64: 128, 128>}]} {
    %c0 = arith.constant 0 : index
    %c0_0 = arith.constant 0 : index
    %0 = vector.load %arg1[%c0, %c0_0] : memref<128x192xbf16, #tpu.memory_space<vmem>>, vector<128x192xbf16>
    %c0_1 = arith.constant 0 : index
    %c0_2 = arith.constant 0 : index
    %1 = vector.load %arg2[%c0_1, %c0_2] : memref<192x128xbf16, #tpu.memory_space<vmem>>, vector<192x128xbf16>
    %cst = arith.constant dense<0.000000e+00> : vector<128x128xf32>
    %2 = tpu.matmul %0, %1, %cst {dimension_numbers = #tpu.dot_dimension_numbers<[1], [0], [0], [1], [0, 0, 1, 1], [], []>} : vector<128x192xbf16>, vector<192x128xbf16>, vector<128x128xf32> -> vector<128x128xf32>
    %c0_3 = arith.constant 0 : index
    %c0_4 = arith.constant 0 : index
    %3 = vector.load %arg3[%c0_3, %c0_4] : memref<1x128xf32, #tpu.memory_space<vmem>>, vector<1x128xf32>
    %4 = vector.broadcast %3 : vector<1x128xf32> to vector<128x128xf32>
    %5 = arith.addf %2, %4 : vector<128x128xf32>
    %6 = arith.truncf %5 : vector<128x128xf32> to vector<128x128xbf16>
    %c0_5 = arith.constant 0 : index
    %c0_6 = arith.constant 0 : index
    %7 = vector.load %arg4[%c0_5, %c0_6] : memref<128x128xbf16, #tpu.memory_space<vmem>>, vector<128x128xbf16>
    tpu.vector_store %arg4[%c0_5, %c0_6], %6 {strides = array<i32>} : memref<128x128xbf16, #tpu.memory_space<vmem>>, vector<128x128xbf16>,
    return
  }
  func.func @transform_0(%arg0: i32) -> (i32, i32) {
    %c0_i32 = arith.constant 0 : i32
    %c0_i32_0 = arith.constant 0 : i32
    return %arg0, %c0_i32 : i32, i32
  }
  func.func @transform_1(%arg0: i32) -> (i32, i32) {
    %c0_i32 = arith.constant 0 : i32
    %c0_i32_0 = arith.constant 0 : i32
    %c0_i32_1 = arith.constant 0 : i32
    return %c0_i32, %c0_i32_0 : i32, i32
  }
  func.func @transform_2(%arg0: i32) -> (i32, i32) {
    %c0_i32 = arith.constant 0 : i32
    %c0_i32_0 = arith.constant 0 : i32
    %c0_i32_1 = arith.constant 0 : i32
    return %c0_i32, %c0_i32_0 : i32, i32
  }
  func.func @transform_3(%arg0: i32) -> (i32, i32) {
    %c0_i32 = arith.constant 0 : i32
    %c0_i32_0 = arith.constant 0 : i32
    return %arg0, %c0_i32 : i32, i32
  }
}

module attributes {stable_mosaic.version = 11 : i64} {
  func.func @_decoder_kernel(%arg0: i32, %arg1: memref<1x64x128xbf16, #tpu.memory_space<vmem>>, %arg2: memref<64x128xbf16, #tpu.memory_space<vmem>>, %arg3: memref<1x128xbf16, #tpu.memory_space<vmem>>, %arg4: memref<1x8x128xbf16, #tpu.memory_space<vmem>>, %arg5: memref<128x128xbf16, #tpu.memory_space<vmem>>, %arg6: memref<1x128xf32, #tpu.memory_space<vmem>>, %arg7: memref<128x128xbf16, #tpu.memory_space<vmem>>, %arg8: memref<1x128xf32, #tpu.memory_space<vmem>>, %arg9: memref<64x4096xbf16, #tpu.memory_space<vmem>>, %arg10: memref<1x1x4096xf32, #tpu.memory_space<vmem>>) attributes {dimension_semantics = [#tpu.dimension_semantics<parallel>], iteration_bounds = array<i64: 2>, scalar_prefetch = 0 : i64, scratch_operands = 0 : i64, tpu.core_type = #tpu.core_type<tc>, window_params = [{transform_indices = @transform_0, window_bounds = array<i64: 1, 64, 128>}, {pipeline_mode = #tpu.pipeline_mode<synchronous>, transform_indices = @transform_1, window_bounds = array<i64: 64, 128>}, {pipeline_mode = #tpu.pipeline_mode<synchronous>, transform_indices = @transform_2, window_bounds = array<i64: 1, 128>}, {transform_indices = @transform_3, window_bounds = array<i64: 1, 8, 128>}, {pipeline_mode = #tpu.pipeline_mode<synchronous>, transform_indices = @transform_4, window_bounds = array<i64: 128, 128>}, {pipeline_mode = #tpu.pipeline_mode<synchronous>, transform_indices = @transform_5, window_bounds = array<i64: 1, 128>}, {pipeline_mode = #tpu.pipeline_mode<synchronous>, transform_indices = @transform_6, window_bounds = array<i64: 128, 128>}, {pipeline_mode = #tpu.pipeline_mode<synchronous>, transform_indices = @transform_7, window_bounds = array<i64: 1, 128>}, {pipeline_mode = #tpu.pipeline_mode<synchronous>, transform_indices = @transform_8, window_bounds = array<i64: 64, 4096>}, {transform_indices = @transform_9, window_bounds = array<i64: 1, 1, 4096>}]} {
    %c0 = arith.constant 0 : index
    %c0_0 = arith.constant 0 : index
    %c0_1 = arith.constant 0 : index
    %0 = vector.load %arg1[%c0, %c0_0, %c0_1] : memref<1x64x128xbf16, #tpu.memory_space<vmem>>, vector<1x64x128xbf16>
    %1 = vector.shape_cast %0 : vector<1x64x128xbf16> to vector<64x128xbf16>
    %c0_2 = arith.constant 0 : index
    %c0_3 = arith.constant 0 : index
    %2 = vector.load %arg3[%c0_2, %c0_3] : memref<1x128xbf16, #tpu.memory_space<vmem>>, vector<1x128xbf16>
    %3 = vector.broadcast %2 : vector<1x128xbf16> to vector<64x128xbf16>
    %4 = arith.addf %1, %3 : vector<64x128xbf16>
    %c0_4 = arith.constant 0 : index
    %c0_5 = arith.constant 0 : index
    %5 = vector.load %arg2[%c0_4, %c0_5] : memref<64x128xbf16, #tpu.memory_space<vmem>>, vector<64x128xbf16>
    %6 = arith.addf %4, %5 : vector<64x128xbf16>
    %c0_6 = arith.constant 0 : index
    %c0_7 = arith.constant 0 : index
    %c0_8 = arith.constant 0 : index
    %7 = vector.load %arg4[%c0_6, %c0_7, %c0_8] : memref<1x8x128xbf16, #tpu.memory_space<vmem>>, vector<1x8x128xbf16>
    %8 = vector.shape_cast %7 : vector<1x8x128xbf16> to vector<8x128xbf16>
    %cst = arith.constant dense<0.000000e+00> : vector<8x64xf32>
    %9 = tpu.matmul %8, %6, %cst {dimension_numbers = #tpu.dot_dimension_numbers<[1], [1], [0], [0], [0, 0, 1, 0], [], []>} : vector<8x128xbf16>, vector<64x128xbf16>, vector<8x64xf32> -> vector<8x64xf32>
    %cst_9 = arith.constant 0.0883883461 : f32
    %10 = vector.broadcast %cst_9 : f32 to vector<8x64xf32>
    %11 = arith.mulf %9, %10 : vector<8x64xf32>
    %cst_10 = arith.constant dense<0xFF800000> : vector<8xf32>
    %12 = vector.multi_reduction <maximumf>, %11, %cst_10 [1] : vector<8x64xf32> to vector<8xf32>
    %13 = vector.shape_cast %12 : vector<8xf32> to vector<8x1xf32>
    %14 = vector.broadcast %13 : vector<8x1xf32> to vector<8x64xf32>
    %15 = arith.subf %11, %14 : vector<8x64xf32>
    %16 = math.exp %15 : vector<8x64xf32>
    %cst_11 = arith.constant dense<0.000000e+00> : vector<8xf32>
    %17 = vector.multi_reduction <add>, %16, %cst_11 [1] : vector<8x64xf32> to vector<8xf32>
    %18 = vector.shape_cast %17 : vector<8xf32> to vector<8x1xf32>
    %19 = tpu.reciprocal %18 {approx = true} : vector<8x1xf32> -> vector<8x1xf32>
    %20 = vector.broadcast %19 : vector<8x1xf32> to vector<8x64xf32>
    %21 = arith.mulf %16, %20 : vector<8x64xf32>
    %22 = arith.extf %8 : vector<8x128xbf16> to vector<8x128xf32>
    %23 = arith.truncf %21 : vector<8x64xf32> to vector<8x64xbf16>
    %cst_12 = arith.constant dense<0.000000e+00> : vector<8x128xf32>
    %24 = tpu.matmul %23, %4, %cst_12 {dimension_numbers = #tpu.dot_dimension_numbers<[1], [0], [0], [1], [0, 0, 1, 1], [], []>} : vector<8x64xbf16>, vector<64x128xbf16>, vector<8x128xf32> -> vector<8x128xf32>
    %25 = arith.addf %22, %24 : vector<8x128xf32>
    %26 = vector.extract_strided_slice %25 {offsets = [0, 0], sizes = [1, 128], strides = [1, 1]} : vector<8x128xf32> to vector<1x128xf32>
    %27 = arith.truncf %26 : vector<1x128xf32> to vector<1x128xbf16>
    %c0_13 = arith.constant 0 : index
    %c0_14 = arith.constant 0 : index
    %28 = vector.load %arg5[%c0_13, %c0_14] : memref<128x128xbf16, #tpu.memory_space<vmem>>, vector<128x128xbf16>
    %cst_15 = arith.constant dense<0.000000e+00> : vector<1x128xf32>
    %29 = tpu.matmul %27, %28, %cst_15 {dimension_numbers = #tpu.dot_dimension_numbers<[1], [0], [0], [1], [0, 0, 1, 1], [], []>} : vector<1x128xbf16>, vector<128x128xbf16>, vector<1x128xf32> -> vector<1x128xf32>
    %c0_16 = arith.constant 0 : index
    %c0_17 = arith.constant 0 : index
    %30 = vector.load %arg6[%c0_16, %c0_17] : memref<1x128xf32, #tpu.memory_space<vmem>>, vector<1x128xf32>
    %31 = arith.addf %29, %30 : vector<1x128xf32>
    %cst_18 = arith.constant 0.000000e+00 : f32
    %32 = vector.broadcast %cst_18 : f32 to vector<1x128xf32>
    %33 = arith.maximumf %31, %32 : vector<1x128xf32>
    %34 = arith.truncf %33 : vector<1x128xf32> to vector<1x128xbf16>
    %c0_19 = arith.constant 0 : index
    %c0_20 = arith.constant 0 : index
    %35 = vector.load %arg7[%c0_19, %c0_20] : memref<128x128xbf16, #tpu.memory_space<vmem>>, vector<128x128xbf16>
    %cst_21 = arith.constant dense<0.000000e+00> : vector<1x128xf32>
    %36 = tpu.matmul %34, %35, %cst_21 {dimension_numbers = #tpu.dot_dimension_numbers<[1], [0], [0], [1], [0, 0, 1, 1], [], []>} : vector<1x128xbf16>, vector<128x128xbf16>, vector<1x128xf32> -> vector<1x128xf32>
    %c0_22 = arith.constant 0 : index
    %c0_23 = arith.constant 0 : index
    %37 = vector.load %arg8[%c0_22, %c0_23] : memref<1x128xf32, #tpu.memory_space<vmem>>, vector<1x128xf32>
    %38 = arith.addf %36, %37 : vector<1x128xf32>
    %39 = arith.truncf %38 : vector<1x128xf32> to vector<1x128xbf16>
    %cst_24 = arith.constant dense<0.000000e+00> : vector<1x64xf32>
    %40 = tpu.matmul %39, %4, %cst_24 {dimension_numbers = #tpu.dot_dimension_numbers<[1], [1], [0], [0], [0, 0, 1, 0], [], []>} : vector<1x128xbf16>, vector<64x128xbf16>, vector<1x64xf32> -> vector<1x64xf32>
    %41 = arith.truncf %40 : vector<1x64xf32> to vector<1x64xbf16>
    %c0_25 = arith.constant 0 : index
    %c0_26 = arith.constant 0 : index
    %42 = vector.load %arg9[%c0_25, %c0_26] : memref<64x4096xbf16, #tpu.memory_space<vmem>>, vector<64x4096xbf16>
    %cst_27 = arith.constant dense<0.000000e+00> : vector<1x4096xf32>
    %43 = tpu.matmul %41, %42, %cst_27 {dimension_numbers = #tpu.dot_dimension_numbers<[1], [0], [0], [1], [0, 0, 1, 1], [], []>} : vector<1x64xbf16>, vector<64x4096xbf16>, vector<1x4096xf32> -> vector<1x4096xf32>
    %c0_28 = arith.constant 0 : index
    %c0_29 = arith.constant 0 : index
    %c0_30 = arith.constant 0 : index
    %44 = vector.load %arg10[%c0_28, %c0_29, %c0_30] : memref<1x1x4096xf32, #tpu.memory_space<vmem>>, vector<1x1x4096xf32>
    %45 = vector.shape_cast %44 : vector<1x1x4096xf32> to vector<1x4096xf32>
    %46 = vector.shape_cast %43 : vector<1x4096xf32> to vector<1x1x4096xf32>
    tpu.vector_store %arg10[%c0_28, %c0_29, %c0_30], %46 {strides = array<i32>} : memref<1x1x4096xf32, #tpu.memory_space<vmem>>, vector<1x1x4096xf32>,
    return
  }
  func.func @transform_0(%arg0: i32) -> (i32, i32, i32) {
    %c0_i32 = arith.constant 0 : i32
    %c0_i32_0 = arith.constant 0 : i32
    %c0_i32_1 = arith.constant 0 : i32
    return %arg0, %c0_i32, %c0_i32_0 : i32, i32, i32
  }
  func.func @transform_1(%arg0: i32) -> (i32, i32) {
    %c0_i32 = arith.constant 0 : i32
    %c0_i32_0 = arith.constant 0 : i32
    %c0_i32_1 = arith.constant 0 : i32
    return %c0_i32, %c0_i32_0 : i32, i32
  }
  func.func @transform_2(%arg0: i32) -> (i32, i32) {
    %c0_i32 = arith.constant 0 : i32
    %c0_i32_0 = arith.constant 0 : i32
    %c0_i32_1 = arith.constant 0 : i32
    return %c0_i32, %c0_i32_0 : i32, i32
  }
  func.func @transform_3(%arg0: i32) -> (i32, i32, i32) {
    %c0_i32 = arith.constant 0 : i32
    %c0_i32_0 = arith.constant 0 : i32
    %c0_i32_1 = arith.constant 0 : i32
    return %arg0, %c0_i32, %c0_i32_0 : i32, i32, i32
  }
  func.func @transform_4(%arg0: i32) -> (i32, i32) {
    %c0_i32 = arith.constant 0 : i32
    %c0_i32_0 = arith.constant 0 : i32
    %c0_i32_1 = arith.constant 0 : i32
    return %c0_i32, %c0_i32_0 : i32, i32
  }
  func.func @transform_5(%arg0: i32) -> (i32, i32) {
    %c0_i32 = arith.constant 0 : i32
    %c0_i32_0 = arith.constant 0 : i32
    %c0_i32_1 = arith.constant 0 : i32
    return %c0_i32, %c0_i32_0 : i32, i32
  }
  func.func @transform_6(%arg0: i32) -> (i32, i32) {
    %c0_i32 = arith.constant 0 : i32
    %c0_i32_0 = arith.constant 0 : i32
    %c0_i32_1 = arith.constant 0 : i32
    return %c0_i32, %c0_i32_0 : i32, i32
  }
  func.func @transform_7(%arg0: i32) -> (i32, i32) {
    %c0_i32 = arith.constant 0 : i32
    %c0_i32_0 = arith.constant 0 : i32
    %c0_i32_1 = arith.constant 0 : i32
    return %c0_i32, %c0_i32_0 : i32, i32
  }
  func.func @transform_8(%arg0: i32) -> (i32, i32) {
    %c0_i32 = arith.constant 0 : i32
    %c0_i32_0 = arith.constant 0 : i32
    %c0_i32_1 = arith.constant 0 : i32
    return %c0_i32, %c0_i32_0 : i32, i32
  }
  func.func @transform_9(%arg0: i32) -> (i32, i32, i32) {
    %c0_i32 = arith.constant 0 : i32
    %c0_i32_0 = arith.constant 0 : i32
    %c0_i32_1 = arith.constant 0 : i32
    return %arg0, %c0_i32, %c0_i32_0 : i32, i32, i32
  }
}

</mosaic_0001>

<bundles_post_ra>
// kernel: sam_forward.2
= control target key start
LH: loop header
LB: loop body
LE: loop exit
PB: predicated region body
PF: predicated region fallthrough
CT: control target
= control target key end

     0   :  { %v589_v0 = vmov 0   ;;  %vm206_vm0 = vcmask 523264   ;;  %s753_s1 = inlined_call_operand.vmem [shape: bf16[192,128], index: 1, kind: input, shape index: {}]   ;;  %s754_s0 = inlined_call_operand.vmem [shape: bf16[128,192], index: 0, kind: input, shape index: {}]   ;;  %s755_s2 = inlined_call_operand.vmem [shape: f32[1,128], index: 2, kind: input, shape index: {}]   ;;  %s756_s3 = inlined_call_operand.vmem [shape: bf16[128,128], index: 3, kind: output, shape index: {}]  }
   0x1   :  { %231 = vmatprep.subr.bf16.mxu0 %v589_v0  ;;  %528 = vmatprep.subr.bf16.mxu1 %v589_v0  ;;  %v553_v1 = vld [vmem:[%s753_s1] sm:$0xff]   ;;  %v554_v2 = vld [vmem:[%s753_s1 + $0x8] sm:$0xff]   ;;  %v555_v3 = vld [vmem:[%s753_s1 + $0x10] sm:$0xff]  }
   0x2   :  { %232 = vmatpush1.bf16.msra.mxu0 %v553_v1  ;;  %540 = vmatpush1.bf16.msra.mxu1 %v553_v1  ;;  %v556_v4 = vld [vmem:[%s753_s1 + $0x18] sm:$0xff]   ;;  %v567_v5 = vld [vmem:[%s754_s0 + $0x4] ss:$8 sps:$4 sm:$0xff]   ;;  %v559_v9 = vld [vmem:[%s753_s1 + $0x30] sm:$0xff]  }
   0x3   :  { %233 = vmatprep.subr.bf16.mxu0 %v589_v0  ;;  %529 = vmatprep.subr.bf16.mxu1 %v589_v0  ;;  %v557_v6 = vld [vmem:[%s753_s1 + $0x20] sm:$0xff]   ;;  %v558_v8 = vld [vmem:[%s753_s1 + $0x28] sm:$0xff]   ;;  %v560_v10 = vld [vmem:[%s753_s1 + $0x38] sm:$0xff]  }
   0x4   :  { %v570_v7 = vld [vmem:[%s754_s0 + $0x44] ss:$8 sps:$4 sm:$0xff]   ;;  %441 = vmatprep.mubr.msk.bf16.mxu0 %vm206_vm0, %v567_v5  ;;  %v563_v13 = vld [vmem:[%s753_s1 + $0x50] sm:$0xff]   ;;  %v564_v14 = vld [vmem:[%s753_s1 + $0x58] sm:$0xff]  }
   0x5   :  { %445 = vmatprep.mubr.msk.bf16.mxu1 %vm206_vm0, %v570_v7  ;;  %v561_v11 = vld [vmem:[%s753_s1 + $0x40] sm:$0xff]   ;;  %v562_v12 = vld [vmem:[%s753_s1 + $0x48] sm:$0xff]   ;;  %v571_v17 = vld [vmem:[%s754_s0 + $0x14] ss:$8 sps:$4 sm:$0xff]  }
   0x6   :  { %234 = vmatpush1.bf16.msra.mxu0 %v554_v2  ;;  %541 = vmatpush1.bf16.msra.mxu1 %v554_v2  ;;  %v565_v15 = vld [vmem:[%s754_s0] ss:$8 sps:$4 sm:$0xff]   ;;  %v573_v18 = vld [vmem:[%s754_s0 + $0x54] ss:$8 sps:$4 sm:$0xff]   ;;  %v575_v19 = vld [vmem:[%s754_s0 + $0x10] ss:$8 sps:$4 sm:$0xff]  }
   0x7   :  { %235 = vmatprep.subr.bf16.mxu0 %v589_v0  ;;  %530 = vmatprep.subr.bf16.mxu1 %v589_v0  ;;  %v568_v16 = vld [vmem:[%s754_s0 + $0x40] ss:$8 sps:$4 sm:$0xff]   ;;  %v576_v20 = vld [vmem:[%s754_s0 + $0x50] ss:$8 sps:$4 sm:$0xff]   ;;  %v577_v21 = vld [vmem:[%s754_s0 + $0x24] ss:$8 sps:$4 sm:$0xff]  }
   0x8   :  { %v579_v22 = vld [vmem:[%s754_s0 + $0x64] ss:$8 sps:$4 sm:$0xff]   ;;  %v581_v23 = vld [vmem:[%s754_s0 + $0x20] ss:$8 sps:$4 sm:$0xff]   ;;  %v583_v25 = vld [vmem:[%s754_s0 + $0x34] ss:$8 sps:$4 sm:$0xff]  }
   0x9   :  { %v582_v24 = vld [vmem:[%s754_s0 + $0x60] ss:$8 sps:$4 sm:$0xff]   ;;  %v585_v26 = vld [vmem:[%s754_s0 + $0x74] ss:$8 sps:$4 sm:$0xff]   ;;  %v587_v27 = vld [vmem:[%s754_s0 + $0x30] ss:$8 sps:$4 sm:$0xff]  }
   0xa   :  { %236 = vmatpush1.bf16.msra.mxu0 %v555_v3  ;;  %542 = vmatpush1.bf16.msra.mxu1 %v555_v3  ;;  %v588_v28 = vld [vmem:[%s754_s0 + $0x70] ss:$8 sps:$4 sm:$0xff]   ;;  %v412_v29 = vld [vmem:[%s755_s2] ss:$0 sm:$0xff] }
   0xb   :  { %237 = vmatprep.subr.bf16.mxu0 %v589_v0  ;;  %531 = vmatprep.subr.bf16.mxu1 %v589_v0 }
   0xe   :  { %238 = vmatpush1.bf16.msra.mxu0 %v556_v4  ;;  %543 = vmatpush1.bf16.msra.mxu1 %v556_v4 }
   0xf   :  { %239 = vmatprep.subr.bf16.mxu0 %v589_v0  ;;  %532 = vmatprep.subr.bf16.mxu1 %v589_v0 }
  0x12   :  { %240 = vmatpush1.bf16.msra.mxu0 %v557_v6  ;;  %544 = vmatpush1.bf16.msra.mxu1 %v557_v6 }
  0x13   :  { %241 = vmatprep.subr.bf16.mxu0 %v589_v0  ;;  %533 = vmatprep.subr.bf16.mxu1 %v589_v0 }
  0x16   :  { %242 = vmatpush1.bf16.msra.mxu0 %v558_v8  ;;  %545 = vmatpush1.bf16.msra.mxu1 %v558_v8 }
  0x17   :  { %243 = vmatprep.subr.bf16.mxu0 %v589_v0  ;;  %534 = vmatprep.subr.bf16.mxu1 %v589_v0 }
  0x1a   :  { %244 = vmatpush1.bf16.msra.mxu0 %v559_v9  ;;  %546 = vmatpush1.bf16.msra.mxu1 %v559_v9 }
  0x1b   :  { %245 = vmatprep.subr.bf16.mxu0 %v589_v0  ;;  %535 = vmatprep.subr.bf16.mxu1 %v589_v0 }
  0x1e   :  { %246 = vmatpush1.bf16.msra.mxu0 %v560_v10  ;;  %547 = vmatpush1.bf16.msra.mxu1 %v560_v10 }
  0x1f   :  { %247 = vmatprep.subr.bf16.mxu0 %v589_v0  ;;  %536 = vmatprep.subr.bf16.mxu1 %v589_v0 }
  0x22   :  { %248 = vmatpush1.bf16.msra.mxu0 %v561_v11  ;;  %548 = vmatpush1.bf16.msra.mxu1 %v561_v11 }
  0x23   :  { %249 = vmatprep.subr.bf16.mxu0 %v589_v0  ;;  %537 = vmatprep.subr.bf16.mxu1 %v589_v0 }
  0x26   :  { %250 = vmatpush1.bf16.msra.mxu0 %v562_v12  ;;  %549 = vmatpush1.bf16.msra.mxu1 %v562_v12 }
  0x27   :  { %251 = vmatprep.subr.bf16.mxu0 %v589_v0  ;;  %538 = vmatprep.subr.bf16.mxu1 %v589_v0 }
  0x2a   :  { %252 = vmatpush1.bf16.msra.mxu0 %v563_v13  ;;  %550 = vmatpush1.bf16.msra.mxu1 %v563_v13 }
  0x2b   :  { %253 = vmatprep.subr.bf16.mxu0 %v589_v0  ;;  %539 = vmatprep.subr.bf16.mxu1 %v589_v0 }
  0x2e   :  { %254 = vmatpush1.bf16.msra.mxu0 %v564_v14  ;;  %551 = vmatpush1.bf16.msra.mxu1 %v564_v14 }
  0x31   :  { %264 = vmatmul.mubr.bf16.vlgmr.msra.gmra.mrb[0].mxu0 %v565_v15  ;;  %296 = vmatmul.mubr.bf16.vlgmr.msra.gmra.mrb[0].mxu1 %v568_v16 }
  0x32   :  { %442 = vmatprep.mubr.msk.bf16.mxu0 %vm206_vm0, %v571_v17  ;;  %446 = vmatprep.mubr.msk.bf16.mxu1 %vm206_vm0, %v573_v18 }
  0x39   :  { %272 = vmatmul.mubr.bf16.gmra.mrb[4].mxu0 %v575_v19  ;;  %304 = vmatmul.mubr.bf16.gmra.mrb[4].mxu1 %v576_v20 }
  0x3a   :  { %443 = vmatprep.mubr.msk.bf16.mxu0 %vm206_vm0, %v577_v21  ;;  %447 = vmatprep.mubr.msk.bf16.mxu1 %vm206_vm0, %v579_v22 }
  0x41   :  { %280 = vmatmul.mubr.bf16.gmra.mrb[8].mxu0 %v581_v23  ;;  %312 = vmatmul.mubr.bf16.gmra.mrb[8].mxu1 %v582_v24 }
  0x42   :  { %444 = vmatprep.mubr.msk.bf16.mxu0 %vm206_vm0, %v583_v25  ;;  %448 = vmatprep.mubr.msk.bf16.mxu1 %vm206_vm0, %v585_v26 }
  0x49   :  { %288 = vmatmul.mubr.bf16.gmra.mrb[12].mxu0 %v587_v27  ;;  %320 = vmatmul.mubr.bf16.gmra.mrb[12].mxu1 %v588_v28 }
 0x104   :  { %v265_v30 = vpop.f32.mrb[0].mxu0  ;;  %v297_v31 = vpop.f32.mrb[0].mxu1 }
 0x105   :  { %v267_v32 = vpop.f32.mrb[1].mxu0  ;;  %v299_v33 = vpop.f32.mrb[1].mxu1  ;;  %v266_v36 = vadd.f32 %v412_v29, %v265_v30  ;;  %v298_v37 = vadd.f32 %v412_v29, %v297_v31 }
 0x106   :  { %v268_v34 = vpop.f32.mrb[2].mxu0  ;;  %v300_v35 = vpop.f32.mrb[2].mxu1 }
 0x107   :  { %v269_v38 = vadd.f32 %v412_v29, %v268_v34  ;;  %v301_v39 = vadd.f32 %v412_v29, %v300_v35  ;;  %v270_v40 = vpop.f32.mrb[3].mxu0  ;;  %v302_v41 = vpop.f32.mrb[3].mxu1 }
 0x109   :  { %v484_v42 = vpack.c.bf16 %v269_v38, %v266_v36  ;;  %v504_v43 = vpack.c.bf16 %v301_v39, %v298_v37 }
 0x10b   :  { %485 = vst [vmem:[%s756_s3] sm:$0xff] %v484_v42   ;;  %524 = vst [vmem:[%s756_s3 + $0x20] sm:$0xff] %v504_v43  }
 0x10c   :  { %v273_v44 = vpop.f32.mrb[4].mxu0  ;;  %v305_v45 = vpop.f32.mrb[4].mxu1 }
 0x10d   :  { %v275_v46 = vpop.f32.mrb[5].mxu0  ;;  %v307_v47 = vpop.f32.mrb[5].mxu1  ;;  %v274_v50 = vadd.f32 %v412_v29, %v273_v44  ;;  %v306_v51 = vadd.f32 %v412_v29, %v305_v45 }
 0x10e   :  { %v276_v48 = vpop.f32.mrb[6].mxu0  ;;  %v308_v49 = vpop.f32.mrb[6].mxu1 }
 0x10f   :  { %v277_v52 = vadd.f32 %v412_v29, %v276_v48  ;;  %v309_v53 = vadd.f32 %v412_v29, %v308_v49  ;;  %v278_v54 = vpop.f32.mrb[7].mxu0  ;;  %v310_v55 = vpop.f32.mrb[7].mxu1 }
 0x111   :  { %v489_v56 = vpack.c.bf16 %v277_v52, %v274_v50  ;;  %v509_v57 = vpack.c.bf16 %v309_v53, %v306_v51 }
 0x113   :  { %521 = vst [vmem:[%s756_s3 + $0x8] sm:$0xff] %v489_v56   ;;  %525 = vst [vmem:[%s756_s3 + $0x28] sm:$0xff] %v509_v57  }
 0x114   :  { %v281_v58 = vpop.f32.mrb[8].mxu0  ;;  %v313_v59 = vpop.f32.mrb[8].mxu1 }
 0x115   :  { %v283_v60 = vpop.f32.mrb[9].mxu0  ;;  %v315_v61 = vpop.f32.mrb[9].mxu1  ;;  %v282_v0 = vadd.f32 %v412_v29, %v281_v58  ;;  %v314_v1 = vadd.f32 %v412_v29, %v313_v59 }
 0x116   :  { %v284_v62 = vpop.f32.mrb[10].mxu0  ;;  %v316_v63 = vpop.f32.mrb[10].mxu1 }
 0x117   :  { %v285_v2 = vadd.f32 %v412_v29, %v284_v62  ;;  %v317_v3 = vadd.f32 %v412_v29, %v316_v63  ;;  %v286_v4 = vpop.f32.mrb[11].mxu0  ;;  %v318_v5 = vpop.f32.mrb[11].mxu1 }
 0x119   :  { %v494_v6 = vpack.c.bf16 %v285_v2, %v282_v0  ;;  %v514_v7 = vpack.c.bf16 %v317_v3, %v314_v1 }
 0x11b   :  { %522 = vst [vmem:[%s756_s3 + $0x10] sm:$0xff] %v494_v6   ;;  %526 = vst [vmem:[%s756_s3 + $0x30] sm:$0xff] %v514_v7  }
 0x11c   :  { %v289_v8 = vpop.f32.mrb[12].mxu0  ;;  %v321_v9 = vpop.f32.mrb[12].mxu1 }
 0x11d   :  { %v291_v10 = vpop.f32.mrb[13].mxu0  ;;  %v323_v11 = vpop.f32.mrb[13].mxu1  ;;  %v290_v14 = vadd.f32 %v412_v29, %v289_v8  ;;  %v322_v15 = vadd.f32 %v412_v29, %v321_v9 }
 0x11e   :  { %v292_v12 = vpop.f32.mrb[14].mxu0  ;;  %v324_v13 = vpop.f32.mrb[14].mxu1 }
 0x11f   :  { %v293_v16 = vadd.f32 %v412_v29, %v292_v12  ;;  %v325_v17 = vadd.f32 %v412_v29, %v324_v13  ;;  %v294_v18 = vpop.f32.mrb[15].mxu0  ;;  %v326_v19 = vpop.f32.mrb[15].mxu1 }
 0x121   :  { %v499_v20 = vpack.c.bf16 %v293_v16, %v290_v14  ;;  %v519_v21 = vpack.c.bf16 %v325_v17, %v322_v15 }
 0x123   :  { %523 = vst [vmem:[%s756_s3 + $0x18] sm:$0xff] %v499_v20   ;;  %527 = vst [vmem:[%s756_s3 + $0x38] sm:$0xff] %v519_v21  }

// kernel: sam_forward.3
= control target key start
LH: loop header
LB: loop body
LE: loop exit
PB: predicated region body
PF: predicated region fallthrough
CT: control target
= control target key end

     0   :  { %s2909_s30 = smov 0   ;;  %s3559_s0 = inlined_call_operand.vmem [shape: bf16[2,64,128], index: 0, kind: input, shape index: {}]   ;;  %s3560_s1 = inlined_call_operand.vmem [shape: bf16[64,128], index: 1, kind: input, shape index: {}]   ;;  %s3561_s2 = inlined_call_operand.vmem [shape: bf16[1,128], index: 2, kind: input, shape index: {}]   ;;  %s3562_s3 = inlined_call_operand.vmem [shape: bf16[2,8,128], index: 3, kind: input, shape index: {}]   ;;  %s3563_s4 = inlined_call_operand.vmem [shape: bf16[128,128], index: 4, kind: input, shape index: {}]   ;;  %s3564_s5 = inlined_call_operand.vmem [shape: f32[1,128], index: 5, kind: input, shape index: {}]   ;;  %s3565_s6 = inlined_call_operand.vmem [shape: bf16[128,128], index: 6, kind: input, shape index: {}]   ;;  %s3566_s7 = inlined_call_operand.vmem [shape: f32[1,128], index: 7, kind: input, shape index: {}]   ;;  %s3567_s8 = inlined_call_operand.vmem [shape: bf16[64,4096], index: 8, kind: input, shape index: {}]   ;;  %s3568_s9 = inlined_call_operand.vmem [shape: f32[2,1,4096], index: 9, kind: output, shape index: {}]  }
   0x1 LB: > { %s2524_s10 = sadd.s32 4294967295, %s2853_s30   ;;  %p2528_p0 = scmp.ge.s32.totalorder %s2853_s30, 1  ;;  %s2853_s30 = sphi %s2909_s30, %s19_s30  }
   0x2   : > { %p296_p1 = scmp.lt.s32.totalorder %s2853_s30, 3 }
   0x4   : > { %p297_p2 = pnand %p2528_p0, %p296_p1 }
   0x5   : > { %p335_p3 = scmp.lt.s32.totalorder (!%p297_p2), %s2524_s10, 1  ;;  %v357_v0 = vld [vmem:[%s3561_s2] sm:$0x1] (!%p297_p2)  ;;  %v361_v1 = vlaneseq (!%p297_p2)  ;;  %v2855_v2 = vmov (!%p297_p2), 0.0   ;;  %vm2856_vm0 = vmmov (!%p297_p2), 0   ;;  %vm459_vm1 = vcmask (!%p297_p2), 523264  }
   0x6   : > { %300 = sbr.rel (%p297_p2) target bundleno = 1800 (0x708), region = 56  ;;  %2739 = vmatprep.subr.bf16.mxu0 (!%p297_p2), %v2855_v2  ;;  %2751 = vmatprep.subr.bf16.mxu1 (!%p297_p2), %v2855_v2  ;;  %v359_v3 = vpack.i.b16 (!%p297_p2), %v357_v0, %v357_v0  ;;  %v377_v9 = vld [vmem:[%s3560_s1] sm:$0xf] (!%p297_p2)  ;;  %v378_v11 = vld [vmem:[%s3560_s1 + $0x4] sm:$0xf] (!%p297_p2) }
   0x7   : > { %v2924_v4 = vshrl.u32 (!%p297_p2), %v361_v1, 7  ;;  %2747 = vmatprep.mubr.msk.bf16.mxu0 (!%p297_p2), %vm2856_vm0, %v2855_v2  ;;  %2759 = vmatprep.mubr.msk.bf16.mxu1 (!%p297_p2), %vm2856_vm0, %v2855_v2  ;;  %v379_v16 = vld [vmem:[%s3560_s1 + $0x8] sm:$0xf] (!%p297_p2)  ;;  %v380_v17 = vld [vmem:[%s3560_s1 + $0xc] sm:$0xf] (!%p297_p2)  ;;  %v2827_v63 = vld [vmem:[%s3563_s4] sm:$0xff] (!%p297_p2)  }
   0x8   : > { %v381_v30 = vld [vmem:[%s3560_s1 + $0x10] sm:$0xf] (!%p297_p2)  ;;  %v382_v31 = vld [vmem:[%s3560_s1 + $0x14] sm:$0xf] (!%p297_p2)  ;;  %v383_v39 = vld [vmem:[%s3560_s1 + $0x18] sm:$0xf] (!%p297_p2) }
   0x9   : > { %v363_v5 = vsub.s32 (!%p297_p2), 0, %v2924_v4  ;;  %v384_v40 = vld [vmem:[%s3560_s1 + $0x1c] sm:$0xf] (!%p297_p2)  ;;  %v2828_v1 = vld [vmem:[%s3563_s4 + $0x8] sm:$0xff] (!%p297_p2)  }
   0xb   : > { %v364_v6 = vrot.slane (!%p297_p2), %v359_v3, %v363_v5  ;;  %v2829_v3 = vld [vmem:[%s3563_s4 + $0x10] sm:$0xff] (!%p297_p2)   ;;  %v2830_v5 = vld [vmem:[%s3563_s4 + $0x18] sm:$0xff] (!%p297_p2)  }
   0xd   : > { %s3570_s10 = smov (!%p335_p3, %s2524_s10), 1  ;;  %v2533_v10 = vcombine.low %v364_v6, %v364_v6  ;;  %v2831_v6 = vld [vmem:[%s3563_s4 + $0x20] sm:$0xff]  }
   0xe   : > { %s2705_s13 = sshll.u32 %s3570_s10, 5  ;;  %s2531_s15 = sshll.u32 %s3570_s10, 2 }
   0xf   : > { %s2933_s16 = scalar_lea.vmem %s3559_s0, %s2705_s13  ;;  %s343_s18 = scalar_lea.vmem %s3562_s3, %s2531_s15 }
  0x10   : > { %v349_v7 = vld [vmem:[%s2933_s16] sm:$0xf]  ;;  %v350_v8 = vld [vmem:[%s2933_s16 + $0x4] sm:$0xf]  ;;  %v351_v12 = vld [vmem:[%s2933_s16 + $0x8] sm:$0xf]  ;;  %s3532_s25 = scalar_lea.vmem %s3568_s9, %s2705_s13 }
  0x11   : > { %v352_v13 = vld [vmem:[%s2933_s16 + $0xc] sm:$0xf]  ;;  %v369_v14 = vadd.bf16 %v2533_v10, %v349_v7  ;;  %v370_v15 = vadd.bf16 %v2533_v10, %v350_v8  ;;  %v371_v20 = vadd.bf16 %v2533_v10, %v351_v12  ;;  %v353_v23 = vld [vmem:[%s2933_s16 + $0x10] sm:$0xf]  ;;  %v354_v24 = vld [vmem:[%s2933_s16 + $0x14] sm:$0xf] }
  0x12   : > { %v372_v21 = vadd.bf16 %v2533_v10, %v352_v13  ;;  %v373_v28 = vadd.bf16 %v2533_v10, %v353_v23  ;;  %v374_v29 = vadd.bf16 %v2533_v10, %v354_v24  ;;  %v355_v34 = vld [vmem:[%s2933_s16 + $0x18] sm:$0xf]  ;;  %v356_v35 = vld [vmem:[%s2933_s16 + $0x1c] sm:$0xf]  ;;  %v2979_v44 = vld [vmem:[%s343_s18] sm:$0xf] }
  0x13   : > { %v385_v18 = vadd.bf16 %v377_v9, %v369_v14  ;;  %v386_v19 = vadd.bf16 %v378_v11, %v370_v15  ;;  %v387_v25 = vadd.bf16 %v379_v16, %v371_v20  ;;  %v375_v37 = vadd.bf16 %v2533_v10, %v355_v34  ;;  %v2832_v7 = vld [vmem:[%s3563_s4 + $0x28] sm:$0xff]   ;;  %v2833_v8 = vld [vmem:[%s3563_s4 + $0x30] sm:$0xff]   ;;  %v2834_v9 = vld [vmem:[%s3563_s4 + $0x38] sm:$0xff]  }
  0x14   : > { %v388_v26 = vadd.bf16 %v380_v17, %v372_v21  ;;  %v389_v32 = vadd.bf16 %v381_v30, %v373_v28  ;;  %v390_v33 = vadd.bf16 %v382_v31, %v374_v29  ;;  %v376_v38 = vadd.bf16 %v2533_v10, %v356_v35  ;;  %v2835_v10 = vld [vmem:[%s3565_s6] sm:$0xff]   ;;  %v2836_v11 = vld [vmem:[%s3565_s6 + $0x8] sm:$0xff]   ;;  %v2837_v12 = vld [vmem:[%s3565_s6 + $0x10] sm:$0xff]  }
  0x15   : > { %v2534_v22 = vcombine.low %v385_v18, %v386_v19  ;;  %v391_v41 = vadd.bf16 %v383_v39, %v375_v37  ;;  %v2986_v56 = vcombine.low %v369_v14, %v370_v15  ;;  %v2989_v57 = vcombine.low %v371_v20, %v372_v21  ;;  %v2838_v13 = vld [vmem:[%s3565_s6 + $0x18] sm:$0xff]   ;;  %v2839_v14 = vld [vmem:[%s3565_s6 + $0x20] sm:$0xff]   ;;  %v2840_v15 = vld [vmem:[%s3565_s6 + $0x28] sm:$0xff]  }
  0x16   : > { %v2535_v27 = vcombine.low %v387_v25, %v388_v26  ;;  %v2536_v36 = vcombine.low %v389_v32, %v390_v33  ;;  %v392_v42 = vadd.bf16 %v384_v40, %v376_v38  ;;  %v2993_v58 = vcombine.low %v373_v28, %v374_v29  ;;  %v2841_v23 = vld [vmem:[%s3565_s6 + $0x30] sm:$0xff]   ;;  %v2842_v24 = vld [vmem:[%s3565_s6 + $0x38] sm:$0xff]   ;;  %v558_v25 = vld [vmem:[%s3564_s5] sm:$0x1] }
  0x17   : > { %2740 = vmatpush3.bf16.xpose.msra.mxu0 %v2534_v22  ;;  %2752 = vmatpush3.bf16.msra.mxu1 %v2986_v56  ;;  %v2997_v59 = vcombine.low %v375_v37, %v376_v38  ;;  %v471_v16 = vunpack.c.l.bf16 %v2979_v44  ;;  %v812_v33 = vld [vmem:[%s3567_s8 + $0x80] sm:$0xff]  ;;  %v798_v34 = vld [vmem:[%s3567_s8 + $0x10] sm:$0xff] }
  0x18   : > { %2741 = vmatprep.subr.bf16.mxu0 %v2855_v2  ;;  %v2537_v43 = vcombine.low %v391_v41, %v392_v42  ;;  %2753 = vmatprep.subr.bf16.mxu1 %v2855_v2  ;;  %v814_v37 = vld [vmem:[%s3567_s8 + $0x90] sm:$0xff]  ;;  %v828_v38 = vld [vmem:[%s3567_s8 + $0x100] sm:$0xff] }
  0x19   : > { %v844_v39 = vld [vmem:[%s3567_s8 + $0x180] sm:$0xff]  ;;  %v2563_v40 = vcombine.low %v798_v34, %v814_v37  ;;  %v2564_v41 = vcombine.high %v798_v34, %v814_v37  ;;  %v909_v37 = vld [vmem:[%s3567_s8 + $0x388] sm:$0xff] }
  0x1a   : > { %v2592_v42 = vcombine.high %v828_v38, %v844_v39 }
  0x1b   : > { %2754 = vmatpush3.bf16.msra.mxu1 %v2989_v57 }
  0x1c   : > { %2755 = vmatprep.subr.bf16.mxu1 %v2855_v2 }
  0x1f   : > { %2742 = vmatpush3.bf16.xpose.msra.mxu0 %v2535_v27  ;;  %2756 = vmatpush3.bf16.msra.mxu1 %v2993_v58 }
  0x20   : > { %2743 = vmatprep.subr.bf16.mxu0 %v2855_v2  ;;  %2757 = vmatprep.subr.bf16.mxu1 %v2855_v2 }
  0x23   : > { %2758 = vmatpush3.bf16.msra.mxu1 %v2997_v59 }
  0x24   : > { %2763 = vmatprep.subr.bf16.mxu1 %v2855_v2 }
  0x27   : > { %2744 = vmatpush3.bf16.xpose.msra.mxu0 %v2536_v36 }
  0x28   : > { %2745 = vmatprep.subr.bf16.mxu0 %v2855_v2 }
  0x2f   : > { %2746 = vmatpush3.bf16.xpose.msra.mxu0 %v2537_v43  ;;  %v2591_v43 = vcombine.low %v828_v38, %v844_v39  ;;  %v896_v38 = vld [vmem:[%s3567_s8 + $0x320] sm:$0xff] }
  0x30   : > { %2783 = vmatprep.subr.bf16.mxu0 %v2855_v2  ;;  %v912_v39 = vld [vmem:[%s3567_s8 + $0x3a0] sm:$0xff] }
  0x36   : > { %2748 = vmatmul.mubr.bf16.vlgmr.msra.gmra.mrb[0].mxu0 %v2979_v44  ;;  %v860_v44 = vld [vmem:[%s3567_s8 + $0x200] sm:$0xff] }
  0x37   : > { %2799 = vmatprep.mubr.msk.bf16.mxu0 %vm2856_vm0, %v2855_v2  ;;  %2784 = vmatpush3.bf16.msra.mxu0 %v2835_v10  ;;  %v813_v10 = vld [vmem:[%s3567_s8 + $0x88] sm:$0xff] }
  0x38   : > { %2785 = vmatprep.subr.bf16.mxu0 %v2855_v2 }
  0x3b   : > { %2786 = vmatpush3.bf16.msra.mxu0 %v2836_v11  ;;  %v800_v11 = vld [vmem:[%s3567_s8 + $0x20] sm:$0xff] }
  0x3c   : > { %2787 = vmatprep.subr.bf16.mxu0 %v2855_v2 }
  0x3f   : > { %2788 = vmatpush3.bf16.msra.mxu0 %v2837_v12 }
  0x40   : > { %2789 = vmatprep.subr.bf16.mxu0 %v2855_v2 }
  0x43   : > { %2790 = vmatpush3.bf16.msra.mxu0 %v2838_v13  ;;  %v816_v13 = vld [vmem:[%s3567_s8 + $0xa0] sm:$0xff] }
  0x44   : > { %2791 = vmatprep.subr.bf16.mxu0 %v2855_v2 }
  0x47   : > { %2792 = vmatpush3.bf16.msra.mxu0 %v2839_v14 }
  0x48   : > { %2793 = vmatprep.subr.bf16.mxu0 %v2855_v2 }
  0x4b   : > { %2794 = vmatpush3.bf16.msra.mxu0 %v2840_v15  ;;  %v2567_v15 = vcombine.low %v800_v11, %v816_v13 }
  0x4c   : > { %2795 = vmatprep.subr.bf16.mxu0 %v2855_v2 }
  0x4f   : > { %2796 = vmatpush3.bf16.msra.mxu0 %v2841_v23 }
  0x50   : > { %2797 = vmatprep.subr.bf16.mxu0 %v2855_v2 }
  0x53   : > { %2798 = vmatpush3.bf16.msra.mxu0 %v2842_v24 }
 0x109   : > { %v452_v45 = vpop.f32.mrb[0].mxu0 }
 0x10a   : > { %v458_v46 = vmul.f32 0.088388346, %v452_v45  ;;  %v2749_v47 = vpop.f32.mrb[1].mxu0  ;;  %v876_v45 = vld [vmem:[%s3567_s8 + $0x280] sm:$0xff] }
 0x10b   : > { %v455_v48 = vpop.f32.mrb[2].mxu0  ;;  %v2623_v47 = vcombine.low %v860_v44, %v876_v45 }
 0x10c   : > { %v2750_v49 = vpop.f32.mrb[3].mxu0  ;;  %v460_v50 = vsel %vm459_vm1, %v458_v46, -inf  ;;  %v892_v48 = vld [vmem:[%s3567_s8 + $0x300] sm:$0xff] }
 0x10d   : > { %461 = vmax.xlane.f32.xlu0 %v460_v50  ;;  %v908_v49 = vld [vmem:[%s3567_s8 + $0x380] sm:$0xff] }
 0x10e   : > { %v2656_v50 = vcombine.high %v892_v48, %v908_v49 }
 0x19a   : > { %v462_v51 = vpop.xlane.xlu0 %461 }
 0x19b   : > { %v463_v52 = vsub.f32 %v458_v46, %v462_v51  ;;  %v2624_v46 = vcombine.high %v860_v44, %v876_v45  ;;  %v2655_v51 = vcombine.low %v892_v48, %v908_v49  ;;  %v799_v44 = vld [vmem:[%s3567_s8 + $0x18] sm:$0xff]  ;;  %v2663_v49 = vcombine.low %v896_v38, %v912_v39 }
 0x19c   : > { %v815_v45 = vld [vmem:[%s3567_s8 + $0x98] sm:$0xff] }
 0x19d   : > { %v464_v53 = vmul.f32 1.442695, %v463_v52  ;;  %v665_v52 = vld [vmem:[%s3566_s7] sm:$0x1] }
 0x19f   : > { %2843 = vpow2.f32 %v464_v53 }
 0x1a9   : > { %v2844_v54 = vpop.eup %2843 }
 0x1aa   : > { %v466_v55 = vsel %vm459_vm1, %v2844_v54, 0.0 }
 0x1ab   : > { %467 = vadd.xlane.f32.xlu0 %v466_v55  ;;  %v846_v55 = vld [vmem:[%s3567_s8 + $0x190] sm:$0xff] }
 0x238   : > { %v468_v60 = vpop.xlane.xlu0 %467 }
 0x239   : > { %2845 = vrcp.f32 %v468_v60 }
 0x243   : > { %v2846_v61 = vpop.eup %2845 }
 0x244   : > { %v470_v62 = vmul.f32 %v2846_v61, %v2844_v54  ;;  %v830_v54 = vld [vmem:[%s3567_s8 + $0x110] sm:$0xff] }
 0x245   : > { %v2596_v61 = vcombine.high %v830_v54, %v846_v55 }
 0x246   : > { %v472_v0 = vpack.c.bf16 %v470_v62, %v470_v62  ;;  %v862_v62 = vld [vmem:[%s3567_s8 + $0x210] sm:$0xff] }
 0x248   : > { %2760 = vmatmul.mubr.msk.bf16.vlgmr.msra.gmra.mrb[0].mxu1 %vm459_vm1, %v472_v0  ;;  %v2595_v0 = vcombine.low %v830_v54, %v846_v55  ;;  %v834_v54 = vld [vmem:[%s3567_s8 + $0x130] sm:$0xff] }
 0x249   : > { %2764 = vmatpush3.bf16.msra.mxu1 %v2827_v63  ;;  %2779 = vmatprep.mubr.msk.bf16.mxu1 %vm2856_vm0, %v2855_v2  ;;  %v878_v63 = vld [vmem:[%s3567_s8 + $0x290] sm:$0xff] }
 0x24a   : > { %2765 = vmatprep.subr.bf16.mxu1 %v2855_v2  ;;  %v850_v55 = vld [vmem:[%s3567_s8 + $0x1b0] sm:$0xff] }
 0x24d   : > { %2766 = vmatpush3.bf16.msra.mxu1 %v2828_v1  ;;  %v2628_v1 = vcombine.high %v862_v62, %v878_v63 }
 0x24e   : > { %2767 = vmatprep.subr.bf16.mxu1 %v2855_v2 }
 0x251   : > { %2768 = vmatpush3.bf16.msra.mxu1 %v2829_v3  ;;  %v894_v3 = vld [vmem:[%s3567_s8 + $0x310] sm:$0xff] }
 0x252   : > { %2769 = vmatprep.subr.bf16.mxu1 %v2855_v2 }
 0x255   : > { %2770 = vmatpush3.bf16.msra.mxu1 %v2830_v5  ;;  %v910_v5 = vld [vmem:[%s3567_s8 + $0x390] sm:$0xff] }
 0x256   : > { %2771 = vmatprep.subr.bf16.mxu1 %v2855_v2 }
 0x259   : > { %2772 = vmatpush3.bf16.msra.mxu1 %v2831_v6  ;;  %v2627_v6 = vcombine.low %v862_v62, %v878_v63  ;;  %v866_v62 = vld [vmem:[%s3567_s8 + $0x230] sm:$0xff] }
 0x25a   : > { %2773 = vmatprep.subr.bf16.mxu1 %v2855_v2  ;;  %v882_v63 = vld [vmem:[%s3567_s8 + $0x2b0] sm:$0xff] }
 0x25d   : > { %2774 = vmatpush3.bf16.msra.mxu1 %v2832_v7  ;;  %v2660_v7 = vcombine.high %v894_v3, %v910_v5 }
 0x25e   : > { %2775 = vmatprep.subr.bf16.mxu1 %v2855_v2 }
 0x261   : > { %2776 = vmatpush3.bf16.msra.mxu1 %v2833_v8  ;;  %v2659_v8 = vcombine.low %v894_v3, %v910_v5  ;;  %v2636_v5 = vcombine.high %v866_v62, %v882_v63 }
 0x262   : > { %2777 = vmatprep.subr.bf16.mxu1 %v2855_v2 }
 0x265   : > { %2778 = vmatpush3.bf16.msra.mxu1 %v2834_v9  ;;  %v797_v9 = vld [vmem:[%s3567_s8 + $0x8] sm:$0xff] }
 0x266   : > { %2803 = vmatprep.subr.bf16.mxu1 %v2855_v2  ;;  %v2562_v12 = vcombine.high %v797_v9, %v813_v10  ;;  %v2561_v14 = vcombine.low %v797_v9, %v813_v10  ;;  %v914_v9 = vld [vmem:[%s3567_s8 + $0x3b0] sm:$0xff] }
 0x31b   : > { %v534_v17 = vpop.f32.mrb[0].mxu1 }
 0x31c   : > { %v540_v18 = vadd.f32 %v534_v17, %v471_v16  ;;  %v2761_v19 = vpop.f32.mrb[1].mxu1  ;;  %v2568_v16 = vcombine.high %v800_v11, %v816_v13  ;;  %v2857_v17 = vmov 0   ;;  %v2635_v11 = vcombine.low %v866_v62, %v882_v63  ;;  %v867_v63 = vld [vmem:[%s3567_s8 + $0x238] sm:$0xff] }
 0x31d   : > { %v537_v20 = vpop.f32.mrb[2].mxu1  ;;  %v845_v19 = vld [vmem:[%s3567_s8 + $0x188] sm:$0xff] }
 0x31e   : > { %v541_v21 = vpack.c.bf16 %v540_v18, %v540_v18  ;;  %v2762_v22 = vpop.f32.mrb[3].mxu1  ;;  %v829_v18 = vld [vmem:[%s3567_s8 + $0x108] sm:$0xff]  ;;  %v832_v20 = vld [vmem:[%s3567_s8 + $0x120] sm:$0xff] }
 0x320   : > { %2780 = vmatmul.mubr.bf16.vlgmr.msra.gmra.mrb[4].mxu1 %v541_v21  ;;  %v848_v21 = vld [vmem:[%s3567_s8 + $0x1a0] sm:$0xff] }
 0x321   : > { %2804 = vmatpush3.bf16.xpose.msra.mxu1 %v2986_v56  ;;  %2811 = vmatprep.mubr.msk.bf16.mxu1 %vm2856_vm0, %v2855_v2 }
 0x322   : > { %2805 = vmatprep.subr.bf16.mxu1 %v2855_v2 }
 0x329   : > { %2806 = vmatpush3.bf16.xpose.msra.mxu1 %v2989_v57 }
 0x32a   : > { %2807 = vmatprep.subr.bf16.mxu1 %v2855_v2 }
 0x331   : > { %2808 = vmatpush3.bf16.xpose.msra.mxu1 %v2993_v58 }
 0x332   : > { %2809 = vmatprep.subr.bf16.mxu1 %v2855_v2  ;;  %v796_v2 = vld [vmem:[%s3567_s8] sm:$0xff] }
 0x333   : > { %v2559_v35 = vcombine.low %v796_v2, %v812_v33  ;;  %v2560_v36 = vcombine.high %v796_v2, %v812_v33  ;;  %v2593_v2 = vcombine.low %v829_v18, %v845_v19  ;;  %v2599_v33 = vcombine.low %v832_v20, %v848_v21 }
 0x335   : > { %1567 = vmatprep.subr.bf16.mxu0 %v2560_v36  ;;  %v893_v36 = vld [vmem:[%s3567_s8 + $0x308] sm:$0xff] }
 0x336   : > { %v2657_v48 = vcombine.low %v893_v36, %v909_v37 }
 0x339   : > { %2810 = vmatpush3.bf16.xpose.msra.mxu1 %v2997_v59 }
 0x33a   : > { %1649 = vmatprep.subr.bf16.mxu1 %v2564_v41 }
 0x3f3   : > { %v641_v26 = vpop.f32.mrb[4].mxu1 }
 0x3f4   : > { %v642_v27 = vadd.f32 %v641_v26, %v558_v25  ;;  %v2781_v28 = vpop.f32.mrb[5].mxu1  ;;  %v2594_v25 = vcombine.high %v829_v18, %v845_v19  ;;  %v2600_v26 = vcombine.high %v832_v20, %v848_v21  ;;  %v820_v18 = vld [vmem:[%s3567_s8 + $0xc0] sm:$0xff] }
 0x3f5   : > { %v644_v29 = vpop.f32.mrb[6].mxu1 }
 0x3f6   : > { %v647_v30 = vmax.f32 %v642_v27, 0.0  ;;  %v2782_v31 = vpop.f32.mrb[7].mxu1  ;;  %v861_v27 = vld [vmem:[%s3567_s8 + $0x208] sm:$0xff] }
 0x3f7   : > { %v877_v29 = vld [vmem:[%s3567_s8 + $0x288] sm:$0xff]  ;;  %v880_v31 = vld [vmem:[%s3567_s8 + $0x2a0] sm:$0xff] }
 0x3f8   : > { %v648_v32 = vpack.c.bf16 %v647_v30, %v647_v30  ;;  %v864_v30 = vld [vmem:[%s3567_s8 + $0x220] sm:$0xff]  ;;  %v2626_v34 = vcombine.high %v861_v27, %v877_v29 }
 0x3f9   : > { %v2631_v41 = vcombine.low %v864_v30, %v880_v31 }
 0x3fa   : > { %2800 = vmatmul.mubr.bf16.vlgmr.msra.gmra.mrb[4].mxu0 %v648_v32 }
 0x3fb   : > { %1568 = vmatpush1.bf16.msra.mxu0 %v2559_v35  ;;  %1599 = vmatprep.mubr.bf16.mxu0 %v2857_v17  ;;  %v2632_v35 = vcombine.high %v864_v30, %v880_v31 }
 0x3fc   : > { %1569 = vmatprep.subr.bf16.mxu0 %v2592_v42  ;;  %v2658_v42 = vcombine.high %v893_v36, %v909_v37 }
 0x3ff   : > { %1570 = vmatpush1.bf16.msra.mxu0 %v2591_v43  ;;  %v2664_v43 = vcombine.high %v896_v38, %v912_v39  ;;  %v897_v39 = vld [vmem:[%s3567_s8 + $0x328] sm:$0xff] }
 0x400   : > { %1571 = vmatprep.subr.bf16.mxu0 %v2624_v46  ;;  %v802_v46 = vld [vmem:[%s3567_s8 + $0x30] sm:$0xff] }
 0x403   : > { %1572 = vmatpush1.bf16.msra.mxu0 %v2623_v47  ;;  %v818_v47 = vld [vmem:[%s3567_s8 + $0xb0] sm:$0xff] }
 0x404   : > { %1573 = vmatprep.subr.bf16.mxu0 %v2656_v50  ;;  %v2566_v50 = vcombine.high %v799_v44, %v815_v45 }
 0x407   : > { %1574 = vmatpush1.bf16.msra.mxu0 %v2655_v51  ;;  %v2572_v51 = vcombine.high %v802_v46, %v818_v47 }
 0x408   : > { %1608 = vmatprep.subr.bf16.mxu0 %v2562_v12 }
 0x4cd   : > { %v748_v53 = vpop.f32.mrb[4].mxu0 }
 0x4ce   : > { %v749_v56 = vadd.f32 %v748_v53, %v665_v52  ;;  %v2801_v57 = vpop.f32.mrb[5].mxu0  ;;  %v831_v52 = vld [vmem:[%s3567_s8 + $0x118] sm:$0xff] }
 0x4cf   : > { %v751_v58 = vpop.f32.mrb[6].mxu0  ;;  %v847_v53 = vld [vmem:[%s3567_s8 + $0x198] sm:$0xff]  ;;  %v2571_v57 = vcombine.low %v802_v46, %v818_v47 }
 0x4d0   : > { %v754_v59 = vpack.c.bf16 %v749_v56, %v749_v56  ;;  %v2802_v60 = vpop.f32.mrb[7].mxu0  ;;  %v2565_v56 = vcombine.low %v799_v44, %v815_v45  ;;  %v2598_v58 = vcombine.high %v831_v52, %v847_v53  ;;  %v803_v47 = vld [vmem:[%s3567_s8 + $0x38] sm:$0xff] }
 0x4d1   : > { %v863_v60 = vld [vmem:[%s3567_s8 + $0x218] sm:$0xff] }
 0x4d2   : > { %2812 = vmatmul.mubr.bf16.vlgmr.msra.gmra.mrb[8].mxu1 %v754_v59  ;;  %v2604_v59 = vcombine.high %v834_v54, %v850_v55 }
 0x4d3   : > { %1650 = vmatpush1.bf16.msra.mxu1 %v2563_v40  ;;  %1681 = vmatprep.mubr.bf16.mxu1 %v2857_v17  ;;  %v2625_v40 = vcombine.low %v861_v27, %v877_v29  ;;  %v852_v27 = vld [vmem:[%s3567_s8 + $0x1c0] sm:$0xff] }
 0x4d4   : > { %1651 = vmatprep.subr.bf16.mxu1 %v2596_v61  ;;  %v879_v61 = vld [vmem:[%s3567_s8 + $0x298] sm:$0xff] }
 0x4d5   : > { %v2630_v3 = vcombine.high %v863_v60, %v879_v61  ;;  %v2629_v10 = vcombine.low %v863_v60, %v879_v61 }
 0x4d7   : > { %1652 = vmatpush1.bf16.msra.mxu1 %v2595_v0  ;;  %v2597_v0 = vcombine.low %v831_v52, %v847_v53 }
 0x4d8   : > { %1653 = vmatprep.subr.bf16.mxu1 %v2628_v1  ;;  %v2603_v1 = vcombine.low %v834_v54, %v850_v55  ;;  %v835_v55 = vld [vmem:[%s3567_s8 + $0x138] sm:$0xff] }
 0x4db   : > { %1654 = vmatpush1.bf16.msra.mxu1 %v2627_v6  ;;  %v895_v6 = vld [vmem:[%s3567_s8 + $0x318] sm:$0xff] }
 0x4dc   : > { %1655 = vmatprep.subr.bf16.mxu1 %v2660_v7  ;;  %v911_v7 = vld [vmem:[%s3567_s8 + $0x398] sm:$0xff] }
 0x4dd   : > { %v2662_v12 = vcombine.high %v895_v6, %v911_v7  ;;  %v2661_v19 = vcombine.low %v895_v6, %v911_v7 }
 0x4df   : > { %1656 = vmatpush1.bf16.msra.mxu1 %v2659_v8  ;;  %v898_v8 = vld [vmem:[%s3567_s8 + $0x330] sm:$0xff] }
 0x4e0   : > { %1731 = vmatprep.subr.bf16.mxu1 %v2568_v16  ;;  %v2668_v13 = vcombine.high %v898_v8, %v914_v9  ;;  %v804_v16 = vld [vmem:[%s3567_s8 + $0x40] sm:$0xff]  ;;  %v2667_v20 = vcombine.low %v898_v8, %v914_v9  ;;  %v899_v9 = vld [vmem:[%s3567_s8 + $0x338] sm:$0xff] }
 0x4e1   : > { %v2575_v29 = vcombine.low %v804_v16, %v820_v18 }
 0x5a5   : > { %v789_v22 = vpop.f32.mrb[8].mxu1 }
 0x5a6   : > { %v3158_v23 = vpack.c.bf16 %v789_v22, %v789_v22  ;;  %v2813_v24 = vpop.f32.mrb[9].mxu1  ;;  %v2576_v22 = vcombine.high %v804_v16, %v820_v18  ;;  %v805_v18 = vld [vmem:[%s3567_s8 + $0x48] sm:$0xff] }
 0x5a7   : > { %v792_v28 = vpop.f32.mrb[10].mxu1  ;;  %v833_v24 = vld [vmem:[%s3567_s8 + $0x128] sm:$0xff] }
 0x5a8   : > { %v2814_v32 = vpop.f32.mrb[11].mxu1  ;;  %2687 = vmatmul.mubr.msk.bf16.vlgmr.msra.gmra.mrb[8].mxu0 %vm459_vm1, %v3158_v23  ;;  %2689 = vmatmul.mubr.msk.bf16.vlgmr.msra.gmra.mrb[12].mxu1 %vm459_vm1, %v3158_v23 }
 0x5a9   : > { %1609 = vmatpush1.bf16.msra.mxu0 %v2561_v14  ;;  %1732 = vmatpush1.bf16.msra.mxu1 %v2567_v15  ;;  %v801_v14 = vld [vmem:[%s3567_s8 + $0x28] sm:$0xff] }
 0x5aa   : > { %1610 = vmatprep.subr.bf16.mxu0 %v2594_v25  ;;  %1733 = vmatprep.subr.bf16.mxu1 %v2600_v26  ;;  %v817_v15 = vld [vmem:[%s3567_s8 + $0xa8] sm:$0xff]  ;;  %v836_v26 = vld [vmem:[%s3567_s8 + $0x140] sm:$0xff] }
 0x5ab   : > { %1640 = vmatprep.mubr.bf16.mxu0 %v2857_v17  ;;  %1763 = vmatprep.mubr.bf16.mxu1 %v2857_v17  ;;  %v2570_v21 = vcombine.high %v801_v14, %v817_v15  ;;  %v849_v25 = vld [vmem:[%s3567_s8 + $0x1a8] sm:$0xff]  ;;  %v2569_v28 = vcombine.low %v801_v14, %v817_v15  ;;  %v2608_v31 = vcombine.high %v836_v26, %v852_v27 }
 0x5ac   : > { %v2602_v30 = vcombine.high %v833_v24, %v849_v25  ;;  %v865_v32 = vld [vmem:[%s3567_s8 + $0x228] sm:$0xff]  ;;  %v2607_v36 = vcombine.low %v836_v26, %v852_v27 }
 0x5ad   : > { %1611 = vmatpush1.bf16.msra.mxu0 %v2593_v2  ;;  %1734 = vmatpush1.bf16.msra.mxu1 %v2599_v33  ;;  %v881_v2 = vld [vmem:[%s3567_s8 + $0x2a8] sm:$0xff]  ;;  %v868_v33 = vld [vmem:[%s3567_s8 + $0x240] sm:$0xff] }
 0x5ae   : > { %1612 = vmatprep.subr.bf16.mxu0 %v2626_v34  ;;  %1735 = vmatprep.subr.bf16.mxu1 %v2632_v35  ;;  %v884_v34 = vld [vmem:[%s3567_s8 + $0x2c0] sm:$0xff]  ;;  %v2601_v35 = vcombine.low %v833_v24, %v849_v25  ;;  %v2634_v37 = vcombine.high %v865_v32, %v881_v2  ;;  %v837_v27 = vld [vmem:[%s3567_s8 + $0x148] sm:$0xff] }
 0x5af   : > { %v2640_v38 = vcombine.high %v868_v33, %v884_v34  ;;  %v2639_v44 = vcombine.low %v868_v33, %v884_v34  ;;  %v869_v34 = vld [vmem:[%s3567_s8 + $0x248] sm:$0xff] }
 0x5b1   : > { %1613 = vmatpush1.bf16.msra.mxu0 %v2625_v40  ;;  %1736 = vmatpush1.bf16.msra.mxu1 %v2631_v41  ;;  %v913_v40 = vld [vmem:[%s3567_s8 + $0x3a8] sm:$0xff]  ;;  %v900_v41 = vld [vmem:[%s3567_s8 + $0x340] sm:$0xff] }
 0x5b2   : > { %1614 = vmatprep.subr.bf16.mxu0 %v2658_v42  ;;  %1737 = vmatprep.subr.bf16.mxu1 %v2664_v43  ;;  %v916_v42 = vld [vmem:[%s3567_s8 + $0x3c0] sm:$0xff]  ;;  %v2633_v43 = vcombine.low %v865_v32, %v881_v2  ;;  %v2666_v45 = vcombine.high %v897_v39, %v913_v40 }
 0x5b3   : > { %v2672_v46 = vcombine.high %v900_v41, %v916_v42  ;;  %v2671_v52 = vcombine.low %v900_v41, %v916_v42  ;;  %v901_v42 = vld [vmem:[%s3567_s8 + $0x348] sm:$0xff] }
 0x5b5   : > { %1615 = vmatpush1.bf16.msra.mxu0 %v2657_v48  ;;  %1738 = vmatpush1.bf16.msra.mxu1 %v2663_v49  ;;  %v819_v48 = vld [vmem:[%s3567_s8 + $0xb8] sm:$0xff]  ;;  %v806_v49 = vld [vmem:[%s3567_s8 + $0x50] sm:$0xff] }
 0x5b6   : > { %1690 = vmatprep.subr.bf16.mxu0 %v2566_v50  ;;  %1813 = vmatprep.subr.bf16.mxu1 %v2572_v51  ;;  %v822_v50 = vld [vmem:[%s3567_s8 + $0xd0] sm:$0xff]  ;;  %v2665_v51 = vcombine.low %v897_v39, %v913_v40  ;;  %v2574_v53 = vcombine.high %v803_v47, %v819_v48 }
 0x5b7   : > { %v2580_v54 = vcombine.high %v806_v49, %v822_v50  ;;  %v2579_v60 = vcombine.low %v806_v49, %v822_v50  ;;  %v807_v50 = vld [vmem:[%s3567_s8 + $0x58] sm:$0xff] }
 0x5b8   : > { %2688 = vmatmul.mubr.msk.bf16.vlgmr.msra.gmra.mrb[12].mxu0 %vm459_vm1, %v3158_v23  ;;  %2691 = vmatmul.mubr.msk.bf16.vlgmr.msra.gmra.mrb[16].mxu1 %vm459_vm1, %v3158_v23 }
 0x5b9   : > { %1691 = vmatpush1.bf16.msra.mxu0 %v2565_v56  ;;  %1814 = vmatpush1.bf16.msra.mxu1 %v2571_v57  ;;  %v851_v56 = vld [vmem:[%s3567_s8 + $0x1b8] sm:$0xff]  ;;  %v838_v57 = vld [vmem:[%s3567_s8 + $0x150] sm:$0xff] }
 0x5ba   : > { %1692 = vmatprep.subr.bf16.mxu0 %v2598_v58  ;;  %1815 = vmatprep.subr.bf16.mxu1 %v2604_v59  ;;  %v854_v58 = vld [vmem:[%s3567_s8 + $0x1d0] sm:$0xff]  ;;  %v2573_v59 = vcombine.low %v803_v47, %v819_v48  ;;  %v2606_v61 = vcombine.high %v835_v55, %v851_v56 }
 0x5bb   : > { %1722 = vmatprep.mubr.bf16.mxu0 %v2857_v17  ;;  %1845 = vmatprep.mubr.bf16.mxu1 %v2857_v17  ;;  %v2612_v62 = vcombine.high %v838_v57, %v854_v58  ;;  %v2611_v6 = vcombine.low %v838_v57, %v854_v58  ;;  %v839_v58 = vld [vmem:[%s3567_s8 + $0x158] sm:$0xff] }
 0x5bd   : > { %1693 = vmatpush1.bf16.msra.mxu0 %v2597_v0  ;;  %1816 = vmatpush1.bf16.msra.mxu1 %v2603_v1  ;;  %v883_v0 = vld [vmem:[%s3567_s8 + $0x2b8] sm:$0xff]  ;;  %v870_v1 = vld [vmem:[%s3567_s8 + $0x250] sm:$0xff] }
 0x5be   : > { %1694 = vmatprep.subr.bf16.mxu0 %v2630_v3  ;;  %1817 = vmatprep.subr.bf16.mxu1 %v2636_v5  ;;  %v886_v3 = vld [vmem:[%s3567_s8 + $0x2d0] sm:$0xff]  ;;  %v2605_v5 = vcombine.low %v835_v55, %v851_v56  ;;  %v2638_v7 = vcombine.high %v867_v63, %v883_v0 }
 0x5bf   : > { %v2644_v8 = vcombine.high %v870_v1, %v886_v3  ;;  %v2643_v14 = vcombine.low %v870_v1, %v886_v3  ;;  %v871_v3 = vld [vmem:[%s3567_s8 + $0x258] sm:$0xff] }
 0x5c1   : > { %1695 = vmatpush1.bf16.msra.mxu0 %v2629_v10  ;;  %1818 = vmatpush1.bf16.msra.mxu1 %v2635_v11  ;;  %v915_v10 = vld [vmem:[%s3567_s8 + $0x3b8] sm:$0xff]  ;;  %v902_v11 = vld [vmem:[%s3567_s8 + $0x350] sm:$0xff] }
 0x5c2   : > { %1696 = vmatprep.subr.bf16.mxu0 %v2662_v12  ;;  %1819 = vmatprep.subr.bf16.mxu1 %v2668_v13  ;;  %v918_v12 = vld [vmem:[%s3567_s8 + $0x3d0] sm:$0xff]  ;;  %v2637_v13 = vcombine.low %v867_v63, %v883_v0  ;;  %v2670_v15 = vcombine.high %v899_v9, %v915_v10 }
 0x5c3   : > { %v2676_v16 = vcombine.high %v902_v11, %v918_v12  ;;  %v2675_v24 = vcombine.low %v902_v11, %v918_v12  ;;  %v903_v12 = vld [vmem:[%s3567_s8 + $0x358] sm:$0xff] }
 0x5c5   : > { %1697 = vmatpush1.bf16.msra.mxu0 %v2661_v19  ;;  %1820 = vmatpush1.bf16.msra.mxu1 %v2667_v20  ;;  %v821_v19 = vld [vmem:[%s3567_s8 + $0xc8] sm:$0xff]  ;;  %v808_v20 = vld [vmem:[%s3567_s8 + $0x60] sm:$0xff] }
 0x5c6   : > { %1772 = vmatprep.subr.bf16.mxu0 %v2570_v21  ;;  %1895 = vmatprep.subr.bf16.mxu1 %v2576_v22  ;;  %v824_v21 = vld [vmem:[%s3567_s8 + $0xe0] sm:$0xff]  ;;  %v2669_v22 = vcombine.low %v899_v9, %v915_v10  ;;  %v2578_v25 = vcombine.high %v805_v18, %v821_v19 }
 0x5c7   : > { %v2584_v26 = vcombine.high %v808_v20, %v824_v21  ;;  %v2583_v32 = vcombine.low %v808_v20, %v824_v21  ;;  %v809_v21 = vld [vmem:[%s3567_s8 + $0x68] sm:$0xff] }
 0x5c8   : > { %2690 = vmatmul.mubr.msk.bf16.vlgmr.msra.gmra.mrb[16].mxu0 %vm459_vm1, %v3158_v23  ;;  %2693 = vmatmul.mubr.msk.bf16.vlgmr.msra.gmra.mrb[20].mxu1 %vm459_vm1, %v3158_v23 }
 0x5c9   : > { %1773 = vmatpush1.bf16.msra.mxu0 %v2569_v28  ;;  %1896 = vmatpush1.bf16.msra.mxu1 %v2575_v29  ;;  %v853_v28 = vld [vmem:[%s3567_s8 + $0x1c8] sm:$0xff]  ;;  %v840_v29 = vld [vmem:[%s3567_s8 + $0x160] sm:$0xff] }
 0x5ca   : > { %1774 = vmatprep.subr.bf16.mxu0 %v2602_v30  ;;  %1897 = vmatprep.subr.bf16.mxu1 %v2608_v31  ;;  %v856_v30 = vld [vmem:[%s3567_s8 + $0x1e0] sm:$0xff]  ;;  %v2577_v31 = vcombine.low %v805_v18, %v821_v19  ;;  %v2610_v2 = vcombine.high %v837_v27, %v853_v28 }
 0x5cb   : > { %1804 = vmatprep.mubr.bf16.mxu0 %v2857_v17  ;;  %1927 = vmatprep.mubr.bf16.mxu1 %v2857_v17  ;;  %v2616_v33 = vcombine.high %v840_v29, %v856_v30  ;;  %v2615_v39 = vcombine.low %v840_v29, %v856_v30 }
 0x5cd   : > { %1775 = vmatpush1.bf16.msra.mxu0 %v2601_v35  ;;  %1898 = vmatpush1.bf16.msra.mxu1 %v2607_v36  ;;  %v885_v35 = vld [vmem:[%s3567_s8 + $0x2c8] sm:$0xff]  ;;  %v872_v36 = vld [vmem:[%s3567_s8 + $0x260] sm:$0xff] }
 0x5ce   : > { %1776 = vmatprep.subr.bf16.mxu0 %v2634_v37  ;;  %1899 = vmatprep.subr.bf16.mxu1 %v2640_v38  ;;  %v888_v37 = vld [vmem:[%s3567_s8 + $0x2e0] sm:$0xff]  ;;  %v2609_v38 = vcombine.low %v837_v27, %v853_v28  ;;  %v2642_v40 = vcombine.high %v869_v34, %v885_v35  ;;  %v841_v27 = vld [vmem:[%s3567_s8 + $0x168] sm:$0xff] }
 0x5cf   : > { %v2648_v41 = vcombine.high %v872_v36, %v888_v37  ;;  %v2647_v47 = vcombine.low %v872_v36, %v888_v37  ;;  %v857_v28 = vld [vmem:[%s3567_s8 + $0x1e8] sm:$0xff] }
 0x5d0   : > { %v2618_v30 = vcombine.high %v841_v27, %v857_v28 }
 0x5d1   : > { %1777 = vmatpush1.bf16.msra.mxu0 %v2633_v43  ;;  %1900 = vmatpush1.bf16.msra.mxu1 %v2639_v44  ;;  %v917_v43 = vld [vmem:[%s3567_s8 + $0x3c8] sm:$0xff]  ;;  %v904_v44 = vld [vmem:[%s3567_s8 + $0x360] sm:$0xff] }
 0x5d2   : > { %1778 = vmatprep.subr.bf16.mxu0 %v2666_v45  ;;  %1901 = vmatprep.subr.bf16.mxu1 %v2672_v46  ;;  %v920_v45 = vld [vmem:[%s3567_s8 + $0x3e0] sm:$0xff]  ;;  %v2641_v46 = vcombine.low %v869_v34, %v885_v35  ;;  %v2674_v48 = vcombine.high %v901_v42, %v917_v43  ;;  %v905_v34 = vld [vmem:[%s3567_s8 + $0x368] sm:$0xff] }
 0x5d3   : > { %v2680_v49 = vcombine.high %v904_v44, %v920_v45  ;;  %v2679_v55 = vcombine.low %v904_v44, %v920_v45  ;;  %v921_v35 = vld [vmem:[%s3567_s8 + $0x3e8] sm:$0xff] }
 0x5d4   : > { %v2682_v37 = vcombine.high %v905_v34, %v921_v35 }
 0x5d5   : > { %1779 = vmatpush1.bf16.msra.mxu0 %v2665_v51  ;;  %1902 = vmatpush1.bf16.msra.mxu1 %v2671_v52  ;;  %v823_v51 = vld [vmem:[%s3567_s8 + $0xd8] sm:$0xff]  ;;  %v810_v52 = vld [vmem:[%s3567_s8 + $0x70] sm:$0xff] }
 0x5d6   : > { %1854 = vmatprep.subr.bf16.mxu0 %v2574_v53  ;;  %1977 = vmatprep.subr.bf16.mxu1 %v2580_v54  ;;  %v826_v53 = vld [vmem:[%s3567_s8 + $0xf0] sm:$0xff]  ;;  %v2673_v54 = vcombine.low %v901_v42, %v917_v43  ;;  %v2582_v56 = vcombine.high %v807_v50, %v823_v51  ;;  %v843_v42 = vld [vmem:[%s3567_s8 + $0x178] sm:$0xff] }
 0x5d7   : > { %v2588_v57 = vcombine.high %v810_v52, %v826_v53  ;;  %v2587_v63 = vcombine.low %v810_v52, %v826_v53  ;;  %v859_v43 = vld [vmem:[%s3567_s8 + $0x1f8] sm:$0xff] }
 0x5d8   : > { %2692 = vmatmul.mubr.msk.bf16.vlgmr.msra.gmra.mrb[20].mxu0 %vm459_vm1, %v3158_v23  ;;  %2695 = vmatmul.mubr.msk.bf16.vlgmr.msra.gmra.mrb[24].mxu1 %vm459_vm1, %v3158_v23  ;;  %v2622_v45 = vcombine.high %v843_v42, %v859_v43 }
 0x5d9   : > { %1855 = vmatpush1.bf16.msra.mxu0 %v2573_v59  ;;  %1978 = vmatpush1.bf16.msra.mxu1 %v2579_v60  ;;  %v855_v59 = vld [vmem:[%s3567_s8 + $0x1d8] sm:$0xff]  ;;  %v842_v60 = vld [vmem:[%s3567_s8 + $0x170] sm:$0xff] }
 0x5da   : > { %1856 = vmatprep.subr.bf16.mxu0 %v2606_v61  ;;  %1979 = vmatprep.subr.bf16.mxu1 %v2612_v62  ;;  %v858_v61 = vld [vmem:[%s3567_s8 + $0x1f0] sm:$0xff]  ;;  %v2581_v62 = vcombine.low %v807_v50, %v823_v51  ;;  %v2614_v0 = vcombine.high %v839_v58, %v855_v59  ;;  %v907_v50 = vld [vmem:[%s3567_s8 + $0x378] sm:$0xff] }
 0x5db   : > { %1886 = vmatprep.mubr.bf16.mxu0 %v2857_v17  ;;  %2009 = vmatprep.mubr.bf16.mxu1 %v2857_v17  ;;  %v2620_v1 = vcombine.high %v842_v60, %v858_v61  ;;  %v2619_v9 = vcombine.low %v842_v60, %v858_v61  ;;  %v923_v51 = vld [vmem:[%s3567_s8 + $0x3f8] sm:$0xff] }
 0x5dc   : > { %v2686_v53 = vcombine.high %v907_v50, %v923_v51 }
 0x5dd   : > { %1857 = vmatpush1.bf16.msra.mxu0 %v2605_v5  ;;  %1980 = vmatpush1.bf16.msra.mxu1 %v2611_v6  ;;  %v887_v5 = vld [vmem:[%s3567_s8 + $0x2d8] sm:$0xff]  ;;  %v874_v6 = vld [vmem:[%s3567_s8 + $0x270] sm:$0xff] }
 0x5de   : > { %1858 = vmatprep.subr.bf16.mxu0 %v2638_v7  ;;  %1981 = vmatprep.subr.bf16.mxu1 %v2644_v8  ;;  %v890_v7 = vld [vmem:[%s3567_s8 + $0x2f0] sm:$0xff]  ;;  %v2613_v8 = vcombine.low %v839_v58, %v855_v59  ;;  %v2646_v10 = vcombine.high %v871_v3, %v887_v5 }
 0x5df   : > { %v2652_v11 = vcombine.high %v874_v6, %v890_v7  ;;  %v2651_v18 = vcombine.low %v874_v6, %v890_v7 }
 0x5e1   : > { %1859 = vmatpush1.bf16.msra.mxu0 %v2637_v13  ;;  %1982 = vmatpush1.bf16.msra.mxu1 %v2643_v14  ;;  %v919_v13 = vld [vmem:[%s3567_s8 + $0x3d8] sm:$0xff]  ;;  %v906_v14 = vld [vmem:[%s3567_s8 + $0x370] sm:$0xff] }
 0x5e2   : > { %1860 = vmatprep.subr.bf16.mxu0 %v2670_v15  ;;  %1983 = vmatprep.subr.bf16.mxu1 %v2676_v16  ;;  %v922_v15 = vld [vmem:[%s3567_s8 + $0x3f0] sm:$0xff]  ;;  %v2645_v16 = vcombine.low %v871_v3, %v887_v5  ;;  %v2678_v19 = vcombine.high %v903_v12, %v919_v13 }
 0x5e3   : > { %v2684_v20 = vcombine.high %v906_v14, %v922_v15 }
 0x5e5   : > { %1861 = vmatpush1.bf16.msra.mxu0 %v2669_v22  ;;  %1984 = vmatpush1.bf16.msra.mxu1 %v2675_v24  ;;  %v825_v22 = vld [vmem:[%s3567_s8 + $0xe8] sm:$0xff]  ;;  %v2677_v24 = vcombine.low %v903_v12, %v919_v13 }
 0x5e6   : > { %1936 = vmatprep.subr.bf16.mxu0 %v2578_v25  ;;  %2059 = vmatprep.subr.bf16.mxu1 %v2584_v26  ;;  %v2683_v25 = vcombine.low %v906_v14, %v922_v15  ;;  %v2586_v26 = vcombine.high %v809_v21, %v825_v22  ;;  %v2585_v29 = vcombine.low %v809_v21, %v825_v22 }
 0x5e8   : > { %2694 = vmatmul.mubr.msk.bf16.vlgmr.msra.gmra.mrb[24].mxu0 %vm459_vm1, %v3158_v23  ;;  %2697 = vmatmul.mubr.msk.bf16.vlgmr.msra.gmra.mrb[28].mxu1 %vm459_vm1, %v3158_v23 }
 0x5e9   : > { %1937 = vmatpush1.bf16.msra.mxu0 %v2577_v31  ;;  %2060 = vmatpush1.bf16.msra.mxu1 %v2583_v32  ;;  %v873_v31 = vld [vmem:[%s3567_s8 + $0x268] sm:$0xff] }
 0x5ea   : > { %1938 = vmatprep.subr.bf16.mxu0 %v2610_v2  ;;  %2061 = vmatprep.subr.bf16.mxu1 %v2616_v33  ;;  %v889_v32 = vld [vmem:[%s3567_s8 + $0x2e8] sm:$0xff]  ;;  %v2617_v2 = vcombine.low %v841_v27, %v857_v28 }
 0x5eb   : > { %1968 = vmatprep.mubr.bf16.mxu0 %v2857_v17  ;;  %2091 = vmatprep.mubr.bf16.mxu1 %v2857_v17  ;;  %v2650_v33 = vcombine.high %v873_v31, %v889_v32  ;;  %v2649_v36 = vcombine.low %v873_v31, %v889_v32 }
 0x5ed   : > { %1939 = vmatpush1.bf16.msra.mxu0 %v2609_v38  ;;  %2062 = vmatpush1.bf16.msra.mxu1 %v2615_v39  ;;  %v811_v38 = vld [vmem:[%s3567_s8 + $0x78] sm:$0xff] }
 0x5ee   : > { %1940 = vmatprep.subr.bf16.mxu0 %v2642_v40  ;;  %2063 = vmatprep.subr.bf16.mxu1 %v2648_v41  ;;  %v827_v39 = vld [vmem:[%s3567_s8 + $0xf8] sm:$0xff]  ;;  %v2681_v40 = vcombine.low %v905_v34, %v921_v35 }
 0x5ef   : > { %v2590_v41 = vcombine.high %v811_v38, %v827_v39  ;;  %v2589_v44 = vcombine.low %v811_v38, %v827_v39 }
 0x5f1   : > { %1941 = vmatpush1.bf16.msra.mxu0 %v2641_v46  ;;  %2064 = vmatpush1.bf16.msra.mxu1 %v2647_v47  ;;  %v875_v46 = vld [vmem:[%s3567_s8 + $0x278] sm:$0xff] }
 0x5f2   : > { %1942 = vmatprep.subr.bf16.mxu0 %v2674_v48  ;;  %2065 = vmatprep.subr.bf16.mxu1 %v2680_v49  ;;  %v891_v47 = vld [vmem:[%s3567_s8 + $0x2f8] sm:$0xff]  ;;  %v2621_v48 = vcombine.low %v843_v42, %v859_v43 }
 0x5f3   : > { %v2654_v49 = vcombine.high %v875_v46, %v891_v47  ;;  %v2653_v52 = vcombine.low %v875_v46, %v891_v47 }
 0x5f5   : > { %1943 = vmatpush1.bf16.msra.mxu0 %v2673_v54  ;;  %2066 = vmatpush1.bf16.msra.mxu1 %v2679_v55  ;;  %v2685_v54 = vcombine.low %v907_v50, %v923_v51 }
 0x5f6   : > { %2018 = vmatprep.subr.bf16.mxu0 %v2582_v56  ;;  %2141 = vmatprep.subr.bf16.mxu1 %v2588_v57 }
 0x5f8   : > { %2696 = vmatmul.mubr.msk.bf16.vlgmr.msra.gmra.mrb[28].mxu0 %vm459_vm1, %v3158_v23  ;;  %2699 = vmatmul.mubr.msk.bf16.vlgmr.msra.gmra.mrb[32].mxu1 %vm459_vm1, %v3158_v23 }
 0x5f9   : > { %2019 = vmatpush1.bf16.msra.mxu0 %v2581_v62  ;;  %2142 = vmatpush1.bf16.msra.mxu1 %v2587_v63 }
 0x5fa   : > { %2020 = vmatprep.subr.bf16.mxu0 %v2614_v0  ;;  %2143 = vmatprep.subr.bf16.mxu1 %v2620_v1  ;;  %v2858_v0 = vmov 1966171168  }
 0x5fb   : > { %2050 = vmatprep.mubr.bf16.mxu0 %v2857_v17  ;;  %2173 = vmatprep.mubr.bf16.mxu1 %v2857_v17  ;;  %v2260_v1 = vunpack.c.l.s4 %v2858_v0 }
 0x5fd   : > { %2021 = vmatpush1.bf16.msra.mxu0 %v2613_v8  ;;  %2144 = vmatpush1.bf16.msra.mxu1 %v2619_v9  ;;  %v2261_v3 = vunpack.c.0.s8 %v2260_v1 }
 0x5fe   : > { %2022 = vmatprep.subr.bf16.mxu0 %v2646_v10  ;;  %2145 = vmatprep.subr.bf16.mxu1 %v2652_v11 }
 0x5ff   : > { %v3519_v5 = vsub.s32 %v2261_v3, %v2924_v4 }
 0x601   : > { %2023 = vmatpush1.bf16.msra.mxu0 %v2645_v16  ;;  %2146 = vmatpush1.bf16.msra.mxu1 %v2651_v18 }
 0x602   : > { %2024 = vmatprep.subr.bf16.mxu0 %v2678_v19  ;;  %2147 = vmatprep.subr.bf16.mxu1 %v2684_v20 }
 0x605   : > { %2025 = vmatpush1.bf16.msra.mxu0 %v2677_v24  ;;  %2148 = vmatpush1.bf16.msra.mxu1 %v2683_v25 }
 0x606   : > { %2100 = vmatprep.subr.bf16.mxu0 %v2586_v26 }
 0x608   : > { %2698 = vmatmul.mubr.msk.bf16.vlgmr.msra.gmra.mrb[32].mxu0 %vm459_vm1, %v3158_v23  ;;  %2701 = vmatmul.mubr.msk.bf16.vlgmr.msra.gmra.mrb[36].mxu1 %vm459_vm1, %v3158_v23 }
 0x609   : > { %2101 = vmatpush1.bf16.msra.mxu0 %v2585_v29  ;;  %2132 = vmatprep.mubr.bf16.mxu0 %v2857_v17 }
 0x60a   : > { %2102 = vmatprep.subr.bf16.mxu0 %v2618_v30 }
 0x60d   : > { %2103 = vmatpush1.bf16.msra.mxu0 %v2617_v2 }
 0x60e   : > { %2104 = vmatprep.subr.bf16.mxu0 %v2650_v33 }
 0x611   : > { %2105 = vmatpush1.bf16.msra.mxu0 %v2649_v36 }
 0x612   : > { %2106 = vmatprep.subr.bf16.mxu0 %v2682_v37 }
 0x615   : > { %2107 = vmatpush1.bf16.msra.mxu0 %v2681_v40 }
 0x616   : > { %2182 = vmatprep.subr.bf16.mxu0 %v2590_v41 }
 0x618   : > { %2700 = vmatmul.mubr.msk.bf16.vlgmr.msra.gmra.mrb[36].mxu0 %vm459_vm1, %v3158_v23 }
 0x619   : > { %2183 = vmatpush1.bf16.msra.mxu0 %v2589_v44  ;;  %2214 = vmatprep.mubr.bf16.mxu0 %v2857_v17 }
 0x61a   : > { %2184 = vmatprep.subr.bf16.mxu0 %v2622_v45 }
 0x61d   : > { %2185 = vmatpush1.bf16.msra.mxu0 %v2621_v48 }
 0x61e   : > { %2186 = vmatprep.subr.bf16.mxu0 %v2654_v49 }
 0x621   : > { %2187 = vmatpush1.bf16.msra.mxu0 %v2653_v52 }
 0x622   : > { %2188 = vmatprep.subr.bf16.mxu0 %v2686_v53 }
 0x625   : > { %2189 = vmatpush1.bf16.msra.mxu0 %v2685_v54 }
 0x628   : > { %2702 = vmatmul.mubr.msk.bf16.vlgmr.msra.gmra.mrb[40].mxu0 %vm459_vm1, %v3158_v23 }
 0x67b   : > { %v1601_v17 = vpop.f32.mrb[8].mxu0  ;;  %v1683_v55 = vpop.f32.mrb[12].mxu1 }
 0x67c   : > { %v1603_v56 = vpop.f32.mrb[9].mxu0  ;;  %v1685_v57 = vpop.f32.mrb[13].mxu1 }
 0x67d   : > { %v2255_v58 = vcombine.low %v1601_v17, %v1603_v56  ;;  %v2257_v59 = vcombine.low %v1683_v55, %v1685_v57  ;;  %v1605_v60 = vpop.f32.mrb[10].mxu0  ;;  %v1687_v61 = vpop.f32.mrb[14].mxu1 }
 0x67e   : > { %v1606_v62 = vpop.f32.mrb[11].mxu0  ;;  %v1688_v63 = vpop.f32.mrb[15].mxu1 }
 0x67f   : > { %v2265_v15 = vrot.slane %v2255_v58, %v3519_v5  ;;  %v2279_v29 = vrot.slane %v2257_v59, %v3519_v5 }
 0x68b   : > { %v1642_v6 = vpop.f32.mrb[12].mxu0  ;;  %v1765_v7 = vpop.f32.mrb[16].mxu1 }
 0x68c   : > { %v1644_v8 = vpop.f32.mrb[13].mxu0  ;;  %v1767_v23 = vpop.f32.mrb[17].mxu1 }
 0x68d   : > { %v2256_v9 = vcombine.low %v1642_v6, %v1644_v8  ;;  %v2304_v10 = vcombine.low %v1765_v7, %v1767_v23  ;;  %v1646_v11 = vpop.f32.mrb[14].mxu0  ;;  %v1769_v12 = vpop.f32.mrb[18].mxu1 }
 0x68e   : > { %v1647_v13 = vpop.f32.mrb[15].mxu0  ;;  %v1770_v14 = vpop.f32.mrb[19].mxu1 }
 0x68f   : > { %v2272_v16 = vrot.slane %v2256_v9, %v3519_v5  ;;  %v2314_v44 = vrot.slane %v2304_v10, %v3519_v5 }
 0x691   : > { %v2287_v18 = vcombine.low %v2265_v15, %v2272_v16 }
 0x693   : > { %v2295_v32 = vrot.slane %v2287_v18, %v3519_v5 }
 0x69b   : > { %v1724_v19 = vpop.f32.mrb[16].mxu0  ;;  %v1847_v20 = vpop.f32.mrb[20].mxu1 }
 0x69c   : > { %v1726_v4 = vpop.f32.mrb[17].mxu0  ;;  %v1849_v21 = vpop.f32.mrb[21].mxu1 }
 0x69d   : > { %v2258_v22 = vcombine.low %v1724_v19, %v1726_v4  ;;  %v2306_v24 = vcombine.low %v1847_v20, %v1849_v21  ;;  %v1728_v25 = vpop.f32.mrb[18].mxu0  ;;  %v1851_v26 = vpop.f32.mrb[22].mxu1 }
 0x69e   : > { %v1729_v27 = vpop.f32.mrb[19].mxu0  ;;  %v1852_v28 = vpop.f32.mrb[23].mxu1 }
 0x69f   : > { %v2286_v30 = vrot.slane %v2258_v22, %v3519_v5  ;;  %v2328_v56 = vrot.slane %v2306_v24, %v3519_v5 }
 0x6a1   : > { %v2288_v31 = vcombine.low %v2279_v29, %v2286_v30 }
 0x6a3   : > { %v2302_v2 = vrot.slane %v2288_v31, %v3519_v5 }
 0x6a5   : > { %v2303_v33 = vcombine.low %v2295_v32, %v2302_v2 }
 0x6a7   : > { %2455 = vst [vmem:[%s3532_s25] sm:$0xff] %v2303_v33 }
 0x6ab   : > { %v1806_v34 = vpop.f32.mrb[20].mxu0  ;;  %v1929_v35 = vpop.f32.mrb[24].mxu1 }
 0x6ac   : > { %v1808_v36 = vpop.f32.mrb[21].mxu0  ;;  %v1931_v37 = vpop.f32.mrb[25].mxu1 }
 0x6ad   : > { %v2305_v38 = vcombine.low %v1806_v34, %v1808_v36  ;;  %v2353_v39 = vcombine.low %v1929_v35, %v1931_v37  ;;  %v1810_v40 = vpop.f32.mrb[22].mxu0  ;;  %v1933_v41 = vpop.f32.mrb[26].mxu1 }
 0x6ae   : > { %v1811_v42 = vpop.f32.mrb[23].mxu0  ;;  %v1934_v43 = vpop.f32.mrb[27].mxu1 }
 0x6af   : > { %v2321_v45 = vrot.slane %v2305_v38, %v3519_v5  ;;  %v2363_v10 = vrot.slane %v2353_v39, %v3519_v5 }
 0x6b1   : > { %v2336_v46 = vcombine.low %v2314_v44, %v2321_v45 }
 0x6b3   : > { %v2344_v59 = vrot.slane %v2336_v46, %v3519_v5 }
 0x6bb   : > { %v1888_v47 = vpop.f32.mrb[24].mxu0  ;;  %v2011_v48 = vpop.f32.mrb[28].mxu1 }
 0x6bc   : > { %v1890_v49 = vpop.f32.mrb[25].mxu0  ;;  %v2013_v50 = vpop.f32.mrb[29].mxu1 }
 0x6bd   : > { %v2307_v51 = vcombine.low %v1888_v47, %v1890_v49  ;;  %v2355_v52 = vcombine.low %v2011_v48, %v2013_v50  ;;  %v1892_v53 = vpop.f32.mrb[26].mxu0  ;;  %v2015_v54 = vpop.f32.mrb[30].mxu1 }
 0x6be   : > { %v1893_v17 = vpop.f32.mrb[27].mxu0  ;;  %v2016_v55 = vpop.f32.mrb[31].mxu1 }
 0x6bf   : > { %v2335_v57 = vrot.slane %v2307_v51, %v3519_v5  ;;  %v2377_v24 = vrot.slane %v2355_v52, %v3519_v5 }
 0x6c1   : > { %v2337_v58 = vcombine.low %v2328_v56, %v2335_v57 }
 0x6c3   : > { %v2351_v60 = vrot.slane %v2337_v58, %v3519_v5 }
 0x6c5   : > { %v2352_v61 = vcombine.low %v2344_v59, %v2351_v60 }
 0x6c7   : > { %2456 = vst [vmem:[%s3532_s25 + $0x8] sm:$0xff] %v2352_v61 }
 0x6cb   : > { %v1970_v62 = vpop.f32.mrb[28].mxu0  ;;  %v2093_v63 = vpop.f32.mrb[32].mxu1 }
 0x6cc   : > { %v1972_v0 = vpop.f32.mrb[29].mxu0  ;;  %v2095_v1 = vpop.f32.mrb[33].mxu1 }
 0x6cd   : > { %v2354_v3 = vcombine.low %v1970_v62, %v1972_v0  ;;  %v2402_v6 = vcombine.low %v2093_v63, %v2095_v1  ;;  %v1974_v7 = vpop.f32.mrb[30].mxu0  ;;  %v2097_v8 = vpop.f32.mrb[34].mxu1 }
 0x6ce   : > { %v1975_v23 = vpop.f32.mrb[31].mxu0  ;;  %v2098_v9 = vpop.f32.mrb[35].mxu1 }
 0x6cf   : > { %v2370_v11 = vrot.slane %v2354_v3, %v3519_v5  ;;  %v2412_v34 = vrot.slane %v2402_v6, %v3519_v5 }
 0x6d1   : > { %v2385_v12 = vcombine.low %v2363_v10, %v2370_v11 }
 0x6d3   : > { %v2393_v27 = vrot.slane %v2385_v12, %v3519_v5 }
 0x6db   : > { %v2052_v13 = vpop.f32.mrb[32].mxu0  ;;  %v2175_v14 = vpop.f32.mrb[36].mxu1 }
 0x6dc   : > { %v2054_v15 = vpop.f32.mrb[33].mxu0  ;;  %v2177_v16 = vpop.f32.mrb[37].mxu1 }
 0x6dd   : > { %v2356_v18 = vcombine.low %v2052_v13, %v2054_v15  ;;  %v2404_v19 = vcombine.low %v2175_v14, %v2177_v16  ;;  %v2056_v20 = vpop.f32.mrb[34].mxu0  ;;  %v2179_v4 = vpop.f32.mrb[38].mxu1 }
 0x6de   : > { %v2057_v21 = vpop.f32.mrb[35].mxu0  ;;  %v2180_v22 = vpop.f32.mrb[39].mxu1 }
 0x6df   : > { %v2384_v25 = vrot.slane %v2356_v18, %v3519_v5  ;;  %v2426_v42 = vrot.slane %v2404_v19, %v3519_v5 }
 0x6e1   : > { %v2386_v26 = vcombine.low %v2377_v24, %v2384_v25 }
 0x6e3   : > { %v2400_v28 = vrot.slane %v2386_v26, %v3519_v5 }
 0x6e5   : > { %v2401_v29 = vcombine.low %v2393_v27, %v2400_v28 }
 0x6e7   : > { %2457 = vst [vmem:[%s3532_s25 + $0x10] sm:$0xff] %v2401_v29 }
 0x6eb   : > { %v2134_v30 = vpop.f32.mrb[36].mxu0 }
 0x6ec   : > { %v2136_v31 = vpop.f32.mrb[37].mxu0 }
 0x6ed   : > { %v2403_v32 = vcombine.low %v2134_v30, %v2136_v31  ;;  %v2138_v2 = vpop.f32.mrb[38].mxu0 }
 0x6ee   : > { %v2139_v33 = vpop.f32.mrb[39].mxu0 }
 0x6ef   : > { %v2419_v35 = vrot.slane %v2403_v32, %v3519_v5 }
 0x6f1   : > { %v2434_v36 = vcombine.low %v2412_v34, %v2419_v35 }
 0x6f3   : > { %v2442_v45 = vrot.slane %v2434_v36, %v3519_v5 }
 0x6fb   : > { %v2216_v37 = vpop.f32.mrb[40].mxu0 }
 0x6fc   : > { %v2218_v38 = vpop.f32.mrb[41].mxu0 }
 0x6fd   : > { %v2405_v39 = vcombine.low %v2216_v37, %v2218_v38  ;;  %v2220_v40 = vpop.f32.mrb[42].mxu0 }
 0x6fe   : > { %v2221_v41 = vpop.f32.mrb[43].mxu0 }
 0x6ff   : > { %v2433_v43 = vrot.slane %v2405_v39, %v3519_v5 }
 0x701   : > { %v2435_v44 = vcombine.low %v2426_v42, %v2433_v43 }
 0x703   : > { %v2449_v46 = vrot.slane %v2435_v44, %v3519_v5 }
 0x705   : > { %v2450_v47 = vcombine.low %v2442_v45, %v2449_v46 }
 0x707   : > { %2458 = vst [vmem:[%s3532_s25 + $0x18] sm:$0xff] %v2450_v47 }
 0x708 PF: > { %s19_s30 = sadd.s32 1, %s2853_s30  }
 0x709   : > { %p16_p4 = scmp.ge.s32.totalorder %s19_s30, 4  }
 0x70b   :  { %18 = sbr.rel (!%p16_p4) target bundleno = 1 (0x1), region = 89 }

</bundles_post_ra>
